<compile_context>
chip_gen: v6e
topology: v6e:2x2x1
jax: 0.10.0
libtpu: 0.0.40
codegen_flags: <defaults>
</compile_context>

<pallas_src>
import functools
import math

import jax
import jax.numpy as jnp
from jax.experimental import pallas as pl
from jax.experimental.pallas import tpu as pltpu

# ----- small hyperparameters consistent with the module -----
NUM_TOKENS = 16
PAD_TOKEN = 0
D_MODEL = 32
NHEAD = 4
NUM_LAYERS = 2
DIM_FF = 64
MAX_SEQ = 16
BATCH = 2
SEQ = 8

VOCAB_OUT = NUM_TOKENS + 1     # 17
VOCAB_PAD = 128                # lane-dense padded logits width

_PER_LAYER = 16                # tensors per decoder layer passed to the kernel


# ----------------------------- Pallas kernel -------------------------------
def _fused_forward_kernel(ids_ref, emb_ref, pe_ref, *refs,
                          num_layers, nhead, num_tokens):
    """One grid step = one batch element: embedding + all layers + fc_out."""
    layer_refs = refs[:_PER_LAYER * num_layers]
    fc_w_ref, fc_b_ref, o_ref = refs[_PER_LAYER * num_layers:]

    b = pl.program_id(0)
    S, D = pe_ref.shape
    H = nhead
    dh = D // H
    NT = num_tokens

    # ---- token embedding via one-hot matmul (gather on the MXU) + pos-enc ----
    row = jax.lax.broadcasted_iota(jnp.int32, (S, NT), 0)
    col = jax.lax.broadcasted_iota(jnp.int32, (S, NT), 1)
    ids_mat = jnp.zeros((S, NT), jnp.int32)
    for s in range(S):                         # S is small and static
        ids_mat = jnp.where(row == s, ids_ref[b, s], ids_mat)
    onehot = (col == ids_mat).astype(jnp.float32)          # (S, NT)
    x = jnp.dot(onehot, emb_ref[...], preferred_element_type=jnp.float32)
    x = x + pe_ref[...]                                     # (S, D)

    # causal mask shared by all layers / heads
    qi = jax.lax.broadcasted_iota(jnp.int32, (S, S), 0)
    ki = jax.lax.broadcasted_iota(jnp.int32, (S, S), 1)
    causal = (ki <= qi)[None]                               # (1, S, S)
    scale = 1.0 / math.sqrt(dh)

    def layer_norm(z, g, beta):
        mu = jnp.mean(z, axis=-1, keepdims=True)
        var = jnp.mean((z - mu) ** 2, axis=-1, keepdims=True)
        return (z - mu) * jax.lax.rsqrt(var + 1e-5) * g + beta

    for l in range(num_layers):                # static unroll over layers
        (wq, bq, wk, bk, wv, bv, wo, bo, g1, be1,
         w1, bf1, w2, bf2, g2, be2) = layer_refs[l * _PER_LAYER:
                                                 (l + 1) * _PER_LAYER]

        # head-batched QKV projections: (H,S,D) @ (H,D,dh) -> (H,S,dh)
        xb = jnp.broadcast_to(x[None], (H, S, D))
        q = jnp.einsum('hsd,hde->hse', xb, wq[...],
                       preferred_element_type=jnp.float32) + bq[...]
        k = jnp.einsum('hsd,hde->hse', xb, wk[...],
                       preferred_element_type=jnp.float32) + bk[...]
        v = jnp.einsum('hsd,hde->hse', xb, wv[...],
                       preferred_element_type=jnp.float32) + bv[...]

        # causal softmax attention for all heads in two batched matmuls
        s = jnp.einsum('hqe,hke->hqk', q, k,
                       preferred_element_type=jnp.float32) * scale
        s = jnp.where(causal, s, -1e30)
        s = s - jnp.max(s, axis=-1, keepdims=True)
        p = jnp.exp(s)
        p = p * pl.reciprocal(jnp.sum(p, axis=-1, keepdims=True), approx=True)
        ctx = jnp.einsum('hqk,hke->hqe', p, v,
                         preferred_element_type=jnp.float32)     # (H,S,dh)

        # output projection: per-head (dh,D) blocks of Wo, summed over heads
        proj = jnp.einsum('hse,hed->hsd', ctx, wo[...],
                          preferred_element_type=jnp.float32)    # (H,S,D)
        attn = jnp.sum(proj, axis=0) + bo[...]                   # (S, D)

        # norm1 WITHOUT residual (matches reference forward)
        h1 = layer_norm(attn, g1[...], be1[...])

        # feed-forward: Linear -> ReLU -> Linear (dropouts are identity)
        ff = jnp.dot(h1, w1[...],
                     preferred_element_type=jnp.float32) + bf1[...]
        ff = jnp.maximum(ff, 0.0)
        ff = jnp.dot(ff, w2[...],
                     preferred_element_type=jnp.float32) + bf2[...]

        # norm2 with residual around FF only
        x = layer_norm(h1 + ff, g2[...], be2[...])

    # lane-dense (padded-to-128) vocab projection
    o_ref[0] = jnp.dot(x, fc_w_ref[...],
                       preferred_element_type=jnp.float32) + fc_b_ref[...]


# ----------------------------- wrappers ------------------------------------
def _full_spec(shape):
    nd = len(shape)
    # index_map receives (grid idx, scalar-prefetch ref)
    return pl.BlockSpec(shape, lambda b, ids, _nd=nd: (0,) * _nd)


def _prep_layer(p, nhead):
    """Reshape layer weights in the wrapper so the kernel needs no reshapes."""
    d = p["wq"].shape[0]
    dh = d // nhead

    def heads_in(w):      # (D, D) -> (H, D, dh): head h = out cols h*dh:(h+1)*dh
        return jnp.transpose(w.reshape(d, nhead, dh), (1, 0, 2))

    def heads_bias(bv):   # (1, D) -> (H, 1, dh)
        return bv.reshape(nhead, dh)[:, None, :]

    return [
        heads_in(p["wq"]), heads_bias(p["bq"]),
        heads_in(p["wk"]), heads_bias(p["bk"]),
        heads_in(p["wv"]), heads_bias(p["bv"]),
        p["wo"].reshape(nhead, dh, d), p["bo"],
        p["g1"], p["be1"],
        p["w1"], p["bf1"], p["w2"], p["bf2"],
        p["g2"], p["be2"],
    ]


def positional_encoding(seq_len):
    # TODO(synk): PositionalEncoding class body was not provided; assumed a
    # (1, S, 2) sin/cos encoding, which the forward tiles d_model//2 times.
    pos = jnp.arange(seq_len, dtype=jnp.float32)[:, None]
    pe = jnp.concatenate([jnp.sin(pos), jnp.cos(pos)], axis=-1)   # (S, 2)
    return pe[None]                                               # (1, S, 2)


def transformer_forward(src, params):
    B, S = src.shape
    D = params["token_embedding"].shape[1]
    H = NHEAD
    dh = D // H
    F = params["layers"][0]["w1"].shape[1]

    pe_full = jnp.tile(positional_encoding(S)[0], (1, D // 2))    # (S, D)

    flat = []
    for lp in params["layers"]:
        flat.extend(_prep_layer(lp, H))

    # pad fc_out weights to a lane-dense (128-wide) output
    fc_w_pad = jnp.zeros((D, VOCAB_PAD), jnp.float32)
    fc_w_pad = fc_w_pad.at[:, :VOCAB_OUT].set(params["fc_w"])
    fc_b_pad = jnp.zeros((1, VOCAB_PAD), jnp.float32)
    fc_b_pad = fc_b_pad.at[:, :VOCAB_OUT].set(params["fc_b"])

    per_layer_shapes = [
        (H, D, dh), (H, 1, dh),            # wq, bq
        (H, D, dh), (H, 1, dh),            # wk, bk
        (H, D, dh), (H, 1, dh),            # wv, bv
        (H, dh, D), (1, D),                # wo, bo
        (1, D), (1, D),                    # norm1 g, b
        (D, F), (1, F), (F, D), (1, D),    # ff w1, b1, w2, b2
        (1, D), (1, D),                    # norm2 g, b
    ]
    in_specs = [_full_spec((NUM_TOKENS, D)),   # embedding table
                _full_spec((S, D))]            # tiled positional encoding
    for _ in params["layers"]:
        in_specs.extend(_full_spec(sh) for sh in per_layer_shapes)
    in_specs.append(_full_spec((D, VOCAB_PAD)))
    in_specs.append(_full_spec((1, VOCAB_PAD)))

    grid_spec = pltpu.PrefetchScalarGridSpec(
        num_scalar_prefetch=1,                 # token ids -> SMEM
        grid=(B,),
        in_specs=in_specs,
        out_specs=pl.BlockSpec((1, S, VOCAB_PAD), lambda b, ids: (b, 0, 0)),
    )

    kernel = functools.partial(
        _fused_forward_kernel,
        num_layers=len(params["layers"]), nhead=H, num_tokens=NUM_TOKENS)

    logits_pad = pl.pallas_call(
        kernel,
        out_shape=jax.ShapeDtypeStruct((B, S, VOCAB_PAD), jnp.float32),
        grid_spec=grid_spec,
        compiler_params=pltpu.CompilerParams(
            dimension_semantics=("parallel",)),   # batch across TCs on v7x
    )(src.astype(jnp.int32), params["token_embedding"], pe_full,
      *flat, fc_w_pad, fc_b_pad)

    out = logits_pad[:, :, :VOCAB_OUT]
    assert out.shape == (B, S, NUM_TOKENS + 1)
    return out


# --------------------------- deterministic init ----------------------------
def _init_layer(key, d, f):
    ks = jax.random.split(key, 6)
    s = 0.05
    return dict(
        wq=jax.random.normal(ks[0], (d, d), jnp.float32) * s,
        bq=jnp.zeros((1, d), jnp.float32),
        wk=jax.random.normal(ks[1], (d, d), jnp.float32) * s,
        bk=jnp.zeros((1, d), jnp.float32),
        wv=jax.random.normal(ks[2], (d, d), jnp.float32) * s,
        bv=jnp.zeros((1, d), jnp.float32),
        wo=jax.random.normal(ks[3], (d, d), jnp.float32) * s,
        bo=jnp.zeros((1, d), jnp.float32),
        g1=jnp.ones((1, d), jnp.float32), be1=jnp.zeros((1, d), jnp.float32),
        w1=jax.random.normal(ks[4], (d, f), jnp.float32) * s,
        bf1=jnp.zeros((1, f), jnp.float32),
        w2=jax.random.normal(ks[5], (f, d), jnp.float32) * s,
        bf2=jnp.zeros((1, d), jnp.float32),
        g2=jnp.ones((1, d), jnp.float32), be2=jnp.zeros((1, d), jnp.float32),
    )


def init_params(key):
    keys = jax.random.split(key, NUM_LAYERS + 2)
    emb = jax.random.normal(keys[0], (NUM_TOKENS, D_MODEL), jnp.float32) * 0.02
    emb = emb.at[PAD_TOKEN].set(0.0)  # padding_idx row zeroed
    fc_w = jax.random.normal(keys[1], (D_MODEL, NUM_TOKENS + 1),
                             jnp.float32) * 0.05
    fc_b = jnp.zeros((1, NUM_TOKENS + 1), jnp.float32)
    layers = [_init_layer(keys[2 + i], D_MODEL, DIM_FF)
              for i in range(NUM_LAYERS)]
    return dict(token_embedding=emb, layers=layers, fc_w=fc_w, fc_b=fc_b)


if __name__ == "__main__":
    key = jax.random.PRNGKey(0)
    pkey, dkey = jax.random.split(key)
    params = init_params(pkey)
    src = jax.random.randint(dkey, (BATCH, SEQ), 0, NUM_TOKENS, dtype=jnp.int32)
    out = transformer_forward(src, params)
    out = jax.block_until_ready(out)
    assert out.shape == (BATCH, SEQ, NUM_TOKENS + 1)
    assert jnp.all(jnp.isfinite(out))
    print("KERNEL_OK")
</pallas_src>

<mosaic_0001>
module attributes {stable_mosaic.version = 11 : i64} {
  func.func @_fused_forward_kernel(%arg0: i32, %arg1: memref<2x8xi32, #tpu.memory_space<smem>>, %arg2: memref<16x32xf32, #tpu.memory_space<vmem>>, %arg3: memref<8x32xf32, #tpu.memory_space<vmem>>, %arg4: memref<4x32x8xf32, #tpu.memory_space<vmem>>, %arg5: memref<4x1x8xf32, #tpu.memory_space<vmem>>, %arg6: memref<4x32x8xf32, #tpu.memory_space<vmem>>, %arg7: memref<4x1x8xf32, #tpu.memory_space<vmem>>, %arg8: memref<4x32x8xf32, #tpu.memory_space<vmem>>, %arg9: memref<4x1x8xf32, #tpu.memory_space<vmem>>, %arg10: memref<4x8x32xf32, #tpu.memory_space<vmem>>, %arg11: memref<1x32xf32, #tpu.memory_space<vmem>>, %arg12: memref<1x32xf32, #tpu.memory_space<vmem>>, %arg13: memref<1x32xf32, #tpu.memory_space<vmem>>, %arg14: memref<32x64xf32, #tpu.memory_space<vmem>>, %arg15: memref<1x64xf32, #tpu.memory_space<vmem>>, %arg16: memref<64x32xf32, #tpu.memory_space<vmem>>, %arg17: memref<1x32xf32, #tpu.memory_space<vmem>>, %arg18: memref<1x32xf32, #tpu.memory_space<vmem>>, %arg19: memref<1x32xf32, #tpu.memory_space<vmem>>, %arg20: memref<4x32x8xf32, #tpu.memory_space<vmem>>, %arg21: memref<4x1x8xf32, #tpu.memory_space<vmem>>, %arg22: memref<4x32x8xf32, #tpu.memory_space<vmem>>, %arg23: memref<4x1x8xf32, #tpu.memory_space<vmem>>, %arg24: memref<4x32x8xf32, #tpu.memory_space<vmem>>, %arg25: memref<4x1x8xf32, #tpu.memory_space<vmem>>, %arg26: memref<4x8x32xf32, #tpu.memory_space<vmem>>, %arg27: memref<1x32xf32, #tpu.memory_space<vmem>>, %arg28: memref<1x32xf32, #tpu.memory_space<vmem>>, %arg29: memref<1x32xf32, #tpu.memory_space<vmem>>, %arg30: memref<32x64xf32, #tpu.memory_space<vmem>>, %arg31: memref<1x64xf32, #tpu.memory_space<vmem>>, %arg32: memref<64x32xf32, #tpu.memory_space<vmem>>, %arg33: memref<1x32xf32, #tpu.memory_space<vmem>>, %arg34: memref<1x32xf32, #tpu.memory_space<vmem>>, %arg35: memref<1x32xf32, #tpu.memory_space<vmem>>, %arg36: memref<32x128xf32, #tpu.memory_space<vmem>>, %arg37: memref<1x128xf32, #tpu.memory_space<vmem>>, %arg38: memref<1x8x128xf32, #tpu.memory_space<vmem>>) attributes {dimension_semantics = [#tpu.dimension_semantics<parallel>], iteration_bounds = array<i64: 2>, scalar_prefetch = 1 : i64, scratch_operands = 0 : i64, tpu.core_type = #tpu.core_type<tc>, window_params = [{pipeline_mode = #tpu.pipeline_mode<synchronous>, transform_indices = @transform_0, window_bounds = array<i64: 16, 32>}, {pipeline_mode = #tpu.pipeline_mode<synchronous>, transform_indices = @transform_1, window_bounds = array<i64: 8, 32>}, {pipeline_mode = #tpu.pipeline_mode<synchronous>, transform_indices = @transform_2, window_bounds = array<i64: 4, 32, 8>}, {pipeline_mode = #tpu.pipeline_mode<synchronous>, transform_indices = @transform_3, window_bounds = array<i64: 4, 1, 8>}, {pipeline_mode = #tpu.pipeline_mode<synchronous>, transform_indices = @transform_4, window_bounds = array<i64: 4, 32, 8>}, {pipeline_mode = #tpu.pipeline_mode<synchronous>, transform_indices = @transform_5, window_bounds = array<i64: 4, 1, 8>}, {pipeline_mode = #tpu.pipeline_mode<synchronous>, transform_indices = @transform_6, window_bounds = array<i64: 4, 32, 8>}, {pipeline_mode = #tpu.pipeline_mode<synchronous>, transform_indices = @transform_7, window_bounds = array<i64: 4, 1, 8>}, {pipeline_mode = #tpu.pipeline_mode<synchronous>, transform_indices = @transform_8, window_bounds = array<i64: 4, 8, 32>}, {pipeline_mode = #tpu.pipeline_mode<synchronous>, transform_indices = @transform_9, window_bounds = array<i64: 1, 32>}, {pipeline_mode = #tpu.pipeline_mode<synchronous>, transform_indices = @transform_10, window_bounds = array<i64: 1, 32>}, {pipeline_mode = #tpu.pipeline_mode<synchronous>, transform_indices = @transform_11, window_bounds = array<i64: 1, 32>}, {pipeline_mode = #tpu.pipeline_mode<synchronous>, transform_indices = @transform_12, window_bounds = array<i64: 32, 64>}, {pipeline_mode = #tpu.pipeline_mode<synchronous>, transform_indices = @transform_13, window_bounds = array<i64: 1, 64>}, {pipeline_mode = #tpu.pipeline_mode<synchronous>, transform_indices = @transform_14, window_bounds = array<i64: 64, 32>}, {pipeline_mode = #tpu.pipeline_mode<synchronous>, transform_indices = @transform_15, window_bounds = array<i64: 1, 32>}, {pipeline_mode = #tpu.pipeline_mode<synchronous>, transform_indices = @transform_16, window_bounds = array<i64: 1, 32>}, {pipeline_mode = #tpu.pipeline_mode<synchronous>, transform_indices = @transform_17, window_bounds = array<i64: 1, 32>}, {pipeline_mode = #tpu.pipeline_mode<synchronous>, transform_indices = @transform_18, window_bounds = array<i64: 4, 32, 8>}, {pipeline_mode = #tpu.pipeline_mode<synchronous>, transform_indices = @transform_19, window_bounds = array<i64: 4, 1, 8>}, {pipeline_mode = #tpu.pipeline_mode<synchronous>, transform_indices = @transform_20, window_bounds = array<i64: 4, 32, 8>}, {pipeline_mode = #tpu.pipeline_mode<synchronous>, transform_indices = @transform_21, window_bounds = array<i64: 4, 1, 8>}, {pipeline_mode = #tpu.pipeline_mode<synchronous>, transform_indices = @transform_22, window_bounds = array<i64: 4, 32, 8>}, {pipeline_mode = #tpu.pipeline_mode<synchronous>, transform_indices = @transform_23, window_bounds = array<i64: 4, 1, 8>}, {pipeline_mode = #tpu.pipeline_mode<synchronous>, transform_indices = @transform_24, window_bounds = array<i64: 4, 8, 32>}, {pipeline_mode = #tpu.pipeline_mode<synchronous>, transform_indices = @transform_25, window_bounds = array<i64: 1, 32>}, {pipeline_mode = #tpu.pipeline_mode<synchronous>, transform_indices = @transform_26, window_bounds = array<i64: 1, 32>}, {pipeline_mode = #tpu.pipeline_mode<synchronous>, transform_indices = @transform_27, window_bounds = array<i64: 1, 32>}, {pipeline_mode = #tpu.pipeline_mode<synchronous>, transform_indices = @transform_28, window_bounds = array<i64: 32, 64>}, {pipeline_mode = #tpu.pipeline_mode<synchronous>, transform_indices = @transform_29, window_bounds = array<i64: 1, 64>}, {pipeline_mode = #tpu.pipeline_mode<synchronous>, transform_indices = @transform_30, window_bounds = array<i64: 64, 32>}, {pipeline_mode = #tpu.pipeline_mode<synchronous>, transform_indices = @transform_31, window_bounds = array<i64: 1, 32>}, {pipeline_mode = #tpu.pipeline_mode<synchronous>, transform_indices = @transform_32, window_bounds = array<i64: 1, 32>}, {pipeline_mode = #tpu.pipeline_mode<synchronous>, transform_indices = @transform_33, window_bounds = array<i64: 1, 32>}, {pipeline_mode = #tpu.pipeline_mode<synchronous>, transform_indices = @transform_34, window_bounds = array<i64: 32, 128>}, {pipeline_mode = #tpu.pipeline_mode<synchronous>, transform_indices = @transform_35, window_bounds = array<i64: 1, 128>}, {transform_indices = @transform_36, window_bounds = array<i64: 1, 8, 128>}]} {
    %0 = tpu.iota {dimensions = array<i32: 0>} : vector<8x16xi32>
    %1 = tpu.iota {dimensions = array<i32: 1>} : vector<8x16xi32>
    %c0_i32 = arith.constant 0 : i32
    %2 = vector.broadcast %c0_i32 : i32 to vector<8x16xi32>
    %c0_i32_0 = arith.constant 0 : i32
    %3 = vector.broadcast %c0_i32_0 : i32 to vector<8x16xi32>
    %4 = arith.cmpi eq, %0, %3 : vector<8x16xi32>
    %5 = arith.index_cast %arg0 : i32 to index
    %c0 = arith.constant 0 : index
    %6 = memref.load %arg1[%5, %c0] : memref<2x8xi32, #tpu.memory_space<smem>>
    %7 = vector.broadcast %6 : i32 to vector<8x16xi32>
    %8 = arith.select %4, %7, %2 : vector<8x16xi1>, vector<8x16xi32>
    %c1_i32 = arith.constant 1 : i32
    %9 = vector.broadcast %c1_i32 : i32 to vector<8x16xi32>
    %10 = arith.cmpi eq, %0, %9 : vector<8x16xi32>
    %11 = arith.index_cast %arg0 : i32 to index
    %c1 = arith.constant 1 : index
    %12 = memref.load %arg1[%11, %c1] : memref<2x8xi32, #tpu.memory_space<smem>>
    %13 = vector.broadcast %12 : i32 to vector<8x16xi32>
    %14 = arith.select %10, %13, %8 : vector<8x16xi1>, vector<8x16xi32>
    %c2_i32 = arith.constant 2 : i32
    %15 = vector.broadcast %c2_i32 : i32 to vector<8x16xi32>
    %16 = arith.cmpi eq, %0, %15 : vector<8x16xi32>
    %17 = arith.index_cast %arg0 : i32 to index
    %c2 = arith.constant 2 : index
    %18 = memref.load %arg1[%17, %c2] : memref<2x8xi32, #tpu.memory_space<smem>>
    %19 = vector.broadcast %18 : i32 to vector<8x16xi32>
    %20 = arith.select %16, %19, %14 : vector<8x16xi1>, vector<8x16xi32>
    %c3_i32 = arith.constant 3 : i32
    %21 = vector.broadcast %c3_i32 : i32 to vector<8x16xi32>
    %22 = arith.cmpi eq, %0, %21 : vector<8x16xi32>
    %23 = arith.index_cast %arg0 : i32 to index
    %c3 = arith.constant 3 : index
    %24 = memref.load %arg1[%23, %c3] : memref<2x8xi32, #tpu.memory_space<smem>>
    %25 = vector.broadcast %24 : i32 to vector<8x16xi32>
    %26 = arith.select %22, %25, %20 : vector<8x16xi1>, vector<8x16xi32>
    %c4_i32 = arith.constant 4 : i32
    %27 = vector.broadcast %c4_i32 : i32 to vector<8x16xi32>
    %28 = arith.cmpi eq, %0, %27 : vector<8x16xi32>
    %29 = arith.index_cast %arg0 : i32 to index
    %c4 = arith.constant 4 : index
    %30 = memref.load %arg1[%29, %c4] : memref<2x8xi32, #tpu.memory_space<smem>>
    %31 = vector.broadcast %30 : i32 to vector<8x16xi32>
    %32 = arith.select %28, %31, %26 : vector<8x16xi1>, vector<8x16xi32>
    %c5_i32 = arith.constant 5 : i32
    %33 = vector.broadcast %c5_i32 : i32 to vector<8x16xi32>
    %34 = arith.cmpi eq, %0, %33 : vector<8x16xi32>
    %35 = arith.index_cast %arg0 : i32 to index
    %c5 = arith.constant 5 : index
    %36 = memref.load %arg1[%35, %c5] : memref<2x8xi32, #tpu.memory_space<smem>>
    %37 = vector.broadcast %36 : i32 to vector<8x16xi32>
    %38 = arith.select %34, %37, %32 : vector<8x16xi1>, vector<8x16xi32>
    %c6_i32 = arith.constant 6 : i32
    %39 = vector.broadcast %c6_i32 : i32 to vector<8x16xi32>
    %40 = arith.cmpi eq, %0, %39 : vector<8x16xi32>
    %41 = arith.index_cast %arg0 : i32 to index
    %c6 = arith.constant 6 : index
    %42 = memref.load %arg1[%41, %c6] : memref<2x8xi32, #tpu.memory_space<smem>>
    %43 = vector.broadcast %42 : i32 to vector<8x16xi32>
    %44 = arith.select %40, %43, %38 : vector<8x16xi1>, vector<8x16xi32>
    %c7_i32 = arith.constant 7 : i32
    %45 = vector.broadcast %c7_i32 : i32 to vector<8x16xi32>
    %46 = arith.cmpi eq, %0, %45 : vector<8x16xi32>
    %47 = arith.index_cast %arg0 : i32 to index
    %c7 = arith.constant 7 : index
    %48 = memref.load %arg1[%47, %c7] : memref<2x8xi32, #tpu.memory_space<smem>>
    %49 = vector.broadcast %48 : i32 to vector<8x16xi32>
    %50 = arith.select %46, %49, %44 : vector<8x16xi1>, vector<8x16xi32>
    %51 = arith.cmpi eq, %1, %50 : vector<8x16xi32>
    %52 = arith.extui %51 : vector<8x16xi1> to vector<8x16xi32>
    %53 = arith.sitofp %52 : vector<8x16xi32> to vector<8x16xf32>
    %c0_1 = arith.constant 0 : index
    %c0_2 = arith.constant 0 : index
    %54 = vector.load %arg2[%c0_1, %c0_2] : memref<16x32xf32, #tpu.memory_space<vmem>>, vector<16x32xf32>
    %cst = arith.constant dense<0.000000e+00> : vector<8x32xf32>
    %55 = tpu.matmul %53, %54, %cst {dimension_numbers = #tpu.dot_dimension_numbers<[1], [0], [0], [1], [0, 0, 1, 1], [], []>} : vector<8x16xf32>, vector<16x32xf32>, vector<8x32xf32> -> vector<8x32xf32>
    %c0_3 = arith.constant 0 : index
    %c0_4 = arith.constant 0 : index
    %56 = vector.load %arg3[%c0_3, %c0_4] : memref<8x32xf32, #tpu.memory_space<vmem>>, vector<8x32xf32>
    %57 = arith.addf %55, %56 : vector<8x32xf32>
    %58 = tpu.iota {dimensions = array<i32: 0>} : vector<8x8xi32>
    %59 = tpu.iota {dimensions = array<i32: 1>} : vector<8x8xi32>
    %60 = arith.cmpi sle, %59, %58 : vector<8x8xi32>
    %61 = vector.shape_cast %60 : vector<8x8xi1> to vector<1x8x8xi1>
    %62 = vector.shape_cast %57 : vector<8x32xf32> to vector<1x8x32xf32>
    %63 = vector.shape_cast %62 : vector<1x8x32xf32> to vector<1x8x32xf32>
    %64 = vector.broadcast %63 : vector<1x8x32xf32> to vector<4x8x32xf32>
    %c0_5 = arith.constant 0 : index
    %c0_6 = arith.constant 0 : index
    %c0_7 = arith.constant 0 : index
    %65 = vector.load %arg4[%c0_5, %c0_6, %c0_7] : memref<4x32x8xf32, #tpu.memory_space<vmem>>, vector<4x32x8xf32>
    "tpu.trace_start"() <{level = 10 : i32, message = "hsd,hde->hse"}> : () -> ()
    %cst_8 = arith.constant dense<0.000000e+00> : vector<4x8x8xf32>
    %66 = tpu.matmul %64, %65, %cst_8 {dimension_numbers = #tpu.dot_dimension_numbers<[2], [1], [1], [2], [0, 0, 0, 1, 1, 2], [0], [0]>} : vector<4x8x32xf32>, vector<4x32x8xf32>, vector<4x8x8xf32> -> vector<4x8x8xf32>
    "tpu.trace_stop"() : () -> ()
    %c0_9 = arith.constant 0 : index
    %c0_10 = arith.constant 0 : index
    %c0_11 = arith.constant 0 : index
    %67 = vector.load %arg5[%c0_9, %c0_10, %c0_11] : memref<4x1x8xf32, #tpu.memory_space<vmem>>, vector<4x1x8xf32>
    %68 = vector.broadcast %67 : vector<4x1x8xf32> to vector<4x8x8xf32>
    %69 = arith.addf %66, %68 : vector<4x8x8xf32>
    %c0_12 = arith.constant 0 : index
    %c0_13 = arith.constant 0 : index
    %c0_14 = arith.constant 0 : index
    %70 = vector.load %arg6[%c0_12, %c0_13, %c0_14] : memref<4x32x8xf32, #tpu.memory_space<vmem>>, vector<4x32x8xf32>
    "tpu.trace_start"() <{level = 10 : i32, message = "hsd,hde->hse"}> : () -> ()
    %cst_15 = arith.constant dense<0.000000e+00> : vector<4x8x8xf32>
    %71 = tpu.matmul %64, %70, %cst_15 {dimension_numbers = #tpu.dot_dimension_numbers<[2], [1], [1], [2], [0, 0, 0, 1, 1, 2], [0], [0]>} : vector<4x8x32xf32>, vector<4x32x8xf32>, vector<4x8x8xf32> -> vector<4x8x8xf32>
    "tpu.trace_stop"() : () -> ()
    %c0_16 = arith.constant 0 : index
    %c0_17 = arith.constant 0 : index
    %c0_18 = arith.constant 0 : index
    %72 = vector.load %arg7[%c0_16, %c0_17, %c0_18] : memref<4x1x8xf32, #tpu.memory_space<vmem>>, vector<4x1x8xf32>
    %73 = vector.broadcast %72 : vector<4x1x8xf32> to vector<4x8x8xf32>
    %74 = arith.addf %71, %73 : vector<4x8x8xf32>
    %c0_19 = arith.constant 0 : index
    %c0_20 = arith.constant 0 : index
    %c0_21 = arith.constant 0 : index
    %75 = vector.load %arg8[%c0_19, %c0_20, %c0_21] : memref<4x32x8xf32, #tpu.memory_space<vmem>>, vector<4x32x8xf32>
    "tpu.trace_start"() <{level = 10 : i32, message = "hsd,hde->hse"}> : () -> ()
    %cst_22 = arith.constant dense<0.000000e+00> : vector<4x8x8xf32>
    %76 = tpu.matmul %64, %75, %cst_22 {dimension_numbers = #tpu.dot_dimension_numbers<[2], [1], [1], [2], [0, 0, 0, 1, 1, 2], [0], [0]>} : vector<4x8x32xf32>, vector<4x32x8xf32>, vector<4x8x8xf32> -> vector<4x8x8xf32>
    "tpu.trace_stop"() : () -> ()
    %c0_23 = arith.constant 0 : index
    %c0_24 = arith.constant 0 : index
    %c0_25 = arith.constant 0 : index
    %77 = vector.load %arg9[%c0_23, %c0_24, %c0_25] : memref<4x1x8xf32, #tpu.memory_space<vmem>>, vector<4x1x8xf32>
    %78 = vector.broadcast %77 : vector<4x1x8xf32> to vector<4x8x8xf32>
    %79 = arith.addf %76, %78 : vector<4x8x8xf32>
    "tpu.trace_start"() <{level = 10 : i32, message = "hqe,hke->hqk"}> : () -> ()
    %cst_26 = arith.constant dense<0.000000e+00> : vector<4x8x8xf32>
    %80 = tpu.matmul %69, %74, %cst_26 {dimension_numbers = #tpu.dot_dimension_numbers<[2], [2], [1], [1], [0, 0, 0, 1, 1, 1], [0], [0]>} : vector<4x8x8xf32>, vector<4x8x8xf32>, vector<4x8x8xf32> -> vector<4x8x8xf32>
    "tpu.trace_stop"() : () -> ()
    %cst_27 = arith.constant 0.353553385 : f32
    %81 = vector.broadcast %cst_27 : f32 to vector<4x8x8xf32>
    %82 = arith.mulf %80, %81 : vector<4x8x8xf32>
    %cst_28 = arith.constant -1.000000e+30 : f32
    %83 = vector.shape_cast %61 : vector<1x8x8xi1> to vector<1x8x8xi1>
    %84 = vector.broadcast %83 : vector<1x8x8xi1> to vector<4x8x8xi1>
    %85 = vector.broadcast %cst_28 : f32 to vector<4x8x8xf32>
    %86 = arith.select %84, %82, %85 : vector<4x8x8xi1>, vector<4x8x8xf32>
    %cst_29 = arith.constant dense<0xFF800000> : vector<4x8xf32>
    %87 = vector.multi_reduction <maximumf>, %86, %cst_29 [2] : vector<4x8x8xf32> to vector<4x8xf32>
    %88 = vector.shape_cast %87 : vector<4x8xf32> to vector<4x8x1xf32>
    %89 = vector.broadcast %88 : vector<4x8x1xf32> to vector<4x8x8xf32>
    %90 = arith.subf %86, %89 : vector<4x8x8xf32>
    %91 = math.exp %90 : vector<4x8x8xf32>
    %cst_30 = arith.constant dense<0.000000e+00> : vector<4x8xf32>
    %92 = vector.multi_reduction <add>, %91, %cst_30 [2] : vector<4x8x8xf32> to vector<4x8xf32>
    %93 = vector.shape_cast %92 : vector<4x8xf32> to vector<4x8x1xf32>
    %94 = tpu.reciprocal %93 {approx = true} : vector<4x8x1xf32> -> vector<4x8x1xf32>
    %95 = vector.broadcast %94 : vector<4x8x1xf32> to vector<4x8x8xf32>
    %96 = arith.mulf %91, %95 : vector<4x8x8xf32>
    "tpu.trace_start"() <{level = 10 : i32, message = "hqk,hke->hqe"}> : () -> ()
    %cst_31 = arith.constant dense<0.000000e+00> : vector<4x8x8xf32>
    %97 = tpu.matmul %96, %79, %cst_31 {dimension_numbers = #tpu.dot_dimension_numbers<[2], [1], [1], [2], [0, 0, 0, 1, 1, 2], [0], [0]>} : vector<4x8x8xf32>, vector<4x8x8xf32>, vector<4x8x8xf32> -> vector<4x8x8xf32>
    "tpu.trace_stop"() : () -> ()
    %c0_32 = arith.constant 0 : index
    %c0_33 = arith.constant 0 : index
    %c0_34 = arith.constant 0 : index
    %98 = vector.load %arg10[%c0_32, %c0_33, %c0_34] : memref<4x8x32xf32, #tpu.memory_space<vmem>>, vector<4x8x32xf32>
    "tpu.trace_start"() <{level = 10 : i32, message = "hse,hed->hsd"}> : () -> ()
    %cst_35 = arith.constant dense<0.000000e+00> : vector<4x8x32xf32>
    %99 = tpu.matmul %97, %98, %cst_35 {dimension_numbers = #tpu.dot_dimension_numbers<[2], [1], [1], [2], [0, 0, 0, 1, 1, 2], [0], [0]>} : vector<4x8x8xf32>, vector<4x8x32xf32>, vector<4x8x32xf32> -> vector<4x8x32xf32>
    "tpu.trace_stop"() : () -> ()
    %cst_36 = arith.constant dense<0.000000e+00> : vector<8x32xf32>
    %100 = vector.multi_reduction <add>, %99, %cst_36 [0] : vector<4x8x32xf32> to vector<8x32xf32>
    %c0_37 = arith.constant 0 : index
    %c0_38 = arith.constant 0 : index
    %101 = vector.load %arg11[%c0_37, %c0_38] : memref<1x32xf32, #tpu.memory_space<vmem>>, vector<1x32xf32>
    %102 = vector.broadcast %101 : vector<1x32xf32> to vector<8x32xf32>
    %103 = arith.addf %100, %102 : vector<8x32xf32>
    %c0_39 = arith.constant 0 : index
    %c0_40 = arith.constant 0 : index
    %104 = vector.load %arg12[%c0_39, %c0_40] : memref<1x32xf32, #tpu.memory_space<vmem>>, vector<1x32xf32>
    %c0_41 = arith.constant 0 : index
    %c0_42 = arith.constant 0 : index
    %105 = vector.load %arg13[%c0_41, %c0_42] : memref<1x32xf32, #tpu.memory_space<vmem>>, vector<1x32xf32>
    %cst_43 = arith.constant dense<0.000000e+00> : vector<8xf32>
    %106 = vector.multi_reduction <add>, %103, %cst_43 [1] : vector<8x32xf32> to vector<8xf32>
    %107 = vector.shape_cast %106 : vector<8xf32> to vector<8x1xf32>
    %cst_44 = arith.constant 3.200000e+01 : f32
    %108 = vector.broadcast %cst_44 : f32 to vector<8x1xf32>
    %109 = arith.divf %107, %108 : vector<8x1xf32>
    %110 = vector.broadcast %109 : vector<8x1xf32> to vector<8x32xf32>
    %111 = arith.subf %103, %110 : vector<8x32xf32>
    %112 = arith.mulf %111, %111 : vector<8x32xf32>
    %cst_45 = arith.constant dense<0.000000e+00> : vector<8xf32>
    %113 = vector.multi_reduction <add>, %112, %cst_45 [1] : vector<8x32xf32> to vector<8xf32>
    %114 = vector.shape_cast %113 : vector<8xf32> to vector<8x1xf32>
    %cst_46 = arith.constant 3.200000e+01 : f32
    %115 = vector.broadcast %cst_46 : f32 to vector<8x1xf32>
    %116 = arith.divf %114, %115 : vector<8x1xf32>
    %117 = vector.broadcast %109 : vector<8x1xf32> to vector<8x32xf32>
    %118 = arith.subf %103, %117 : vector<8x32xf32>
    %cst_47 = arith.constant 9.99999974E-6 : f32
    %119 = vector.broadcast %cst_47 : f32 to vector<8x1xf32>
    %120 = arith.addf %116, %119 : vector<8x1xf32>
    %121 = math.rsqrt %120 : vector<8x1xf32>
    %122 = vector.broadcast %121 : vector<8x1xf32> to vector<8x32xf32>
    %123 = arith.mulf %118, %122 : vector<8x32xf32>
    %124 = vector.broadcast %104 : vector<1x32xf32> to vector<8x32xf32>
    %125 = arith.mulf %123, %124 : vector<8x32xf32>
    %126 = vector.broadcast %105 : vector<1x32xf32> to vector<8x32xf32>
    %127 = arith.addf %125, %126 : vector<8x32xf32>
    %c0_48 = arith.constant 0 : index
    %c0_49 = arith.constant 0 : index
    %128 = vector.load %arg14[%c0_48, %c0_49] : memref<32x64xf32, #tpu.memory_space<vmem>>, vector<32x64xf32>
    %cst_50 = arith.constant dense<0.000000e+00> : vector<8x64xf32>
    %129 = tpu.matmul %127, %128, %cst_50 {dimension_numbers = #tpu.dot_dimension_numbers<[1], [0], [0], [1], [0, 0, 1, 1], [], []>} : vector<8x32xf32>, vector<32x64xf32>, vector<8x64xf32> -> vector<8x64xf32>
    %c0_51 = arith.constant 0 : index
    %c0_52 = arith.constant 0 : index
    %130 = vector.load %arg15[%c0_51, %c0_52] : memref<1x64xf32, #tpu.memory_space<vmem>>, vector<1x64xf32>
    %131 = vector.broadcast %130 : vector<1x64xf32> to vector<8x64xf32>
    %132 = arith.addf %129, %131 : vector<8x64xf32>
    %cst_53 = arith.constant 0.000000e+00 : f32
    %133 = vector.broadcast %cst_53 : f32 to vector<8x64xf32>
    %134 = arith.maximumf %132, %133 : vector<8x64xf32>
    %c0_54 = arith.constant 0 : index
    %c0_55 = arith.constant 0 : index
    %135 = vector.load %arg16[%c0_54, %c0_55] : memref<64x32xf32, #tpu.memory_space<vmem>>, vector<64x32xf32>
    %cst_56 = arith.constant dense<0.000000e+00> : vector<8x32xf32>
    %136 = tpu.matmul %134, %135, %cst_56 {dimension_numbers = #tpu.dot_dimension_numbers<[1], [0], [0], [1], [0, 0, 1, 1], [], []>} : vector<8x64xf32>, vector<64x32xf32>, vector<8x32xf32> -> vector<8x32xf32>
    %c0_57 = arith.constant 0 : index
    %c0_58 = arith.constant 0 : index
    %137 = vector.load %arg17[%c0_57, %c0_58] : memref<1x32xf32, #tpu.memory_space<vmem>>, vector<1x32xf32>
    %138 = vector.broadcast %137 : vector<1x32xf32> to vector<8x32xf32>
    %139 = arith.addf %136, %138 : vector<8x32xf32>
    %140 = arith.addf %127, %139 : vector<8x32xf32>
    %c0_59 = arith.constant 0 : index
    %c0_60 = arith.constant 0 : index
    %141 = vector.load %arg18[%c0_59, %c0_60] : memref<1x32xf32, #tpu.memory_space<vmem>>, vector<1x32xf32>
    %c0_61 = arith.constant 0 : index
    %c0_62 = arith.constant 0 : index
    %142 = vector.load %arg19[%c0_61, %c0_62] : memref<1x32xf32, #tpu.memory_space<vmem>>, vector<1x32xf32>
    %cst_63 = arith.constant dense<0.000000e+00> : vector<8xf32>
    %143 = vector.multi_reduction <add>, %140, %cst_63 [1] : vector<8x32xf32> to vector<8xf32>
    %144 = vector.shape_cast %143 : vector<8xf32> to vector<8x1xf32>
    %cst_64 = arith.constant 3.200000e+01 : f32
    %145 = vector.broadcast %cst_64 : f32 to vector<8x1xf32>
    %146 = arith.divf %144, %145 : vector<8x1xf32>
    %147 = vector.broadcast %146 : vector<8x1xf32> to vector<8x32xf32>
    %148 = arith.subf %140, %147 : vector<8x32xf32>
    %149 = arith.mulf %148, %148 : vector<8x32xf32>
    %cst_65 = arith.constant dense<0.000000e+00> : vector<8xf32>
    %150 = vector.multi_reduction <add>, %149, %cst_65 [1] : vector<8x32xf32> to vector<8xf32>
    %151 = vector.shape_cast %150 : vector<8xf32> to vector<8x1xf32>
    %cst_66 = arith.constant 3.200000e+01 : f32
    %152 = vector.broadcast %cst_66 : f32 to vector<8x1xf32>
    %153 = arith.divf %151, %152 : vector<8x1xf32>
    %154 = vector.broadcast %146 : vector<8x1xf32> to vector<8x32xf32>
    %155 = arith.subf %140, %154 : vector<8x32xf32>
    %cst_67 = arith.constant 9.99999974E-6 : f32
    %156 = vector.broadcast %cst_67 : f32 to vector<8x1xf32>
    %157 = arith.addf %153, %156 : vector<8x1xf32>
    %158 = math.rsqrt %157 : vector<8x1xf32>
    %159 = vector.broadcast %158 : vector<8x1xf32> to vector<8x32xf32>
    %160 = arith.mulf %155, %159 : vector<8x32xf32>
    %161 = vector.broadcast %141 : vector<1x32xf32> to vector<8x32xf32>
    %162 = arith.mulf %160, %161 : vector<8x32xf32>
    %163 = vector.broadcast %142 : vector<1x32xf32> to vector<8x32xf32>
    %164 = arith.addf %162, %163 : vector<8x32xf32>
    %165 = vector.shape_cast %164 : vector<8x32xf32> to vector<1x8x32xf32>
    %166 = vector.shape_cast %165 : vector<1x8x32xf32> to vector<1x8x32xf32>
    %167 = vector.broadcast %166 : vector<1x8x32xf32> to vector<4x8x32xf32>
    %c0_68 = arith.constant 0 : index
    %c0_69 = arith.constant 0 : index
    %c0_70 = arith.constant 0 : index
    %168 = vector.load %arg20[%c0_68, %c0_69, %c0_70] : memref<4x32x8xf32, #tpu.memory_space<vmem>>, vector<4x32x8xf32>
    "tpu.trace_start"() <{level = 10 : i32, message = "hsd,hde->hse"}> : () -> ()
    %cst_71 = arith.constant dense<0.000000e+00> : vector<4x8x8xf32>
    %169 = tpu.matmul %167, %168, %cst_71 {dimension_numbers = #tpu.dot_dimension_numbers<[2], [1], [1], [2], [0, 0, 0, 1, 1, 2], [0], [0]>} : vector<4x8x32xf32>, vector<4x32x8xf32>, vector<4x8x8xf32> -> vector<4x8x8xf32>
    "tpu.trace_stop"() : () -> ()
    %c0_72 = arith.constant 0 : index
    %c0_73 = arith.constant 0 : index
    %c0_74 = arith.constant 0 : index
    %170 = vector.load %arg21[%c0_72, %c0_73, %c0_74] : memref<4x1x8xf32, #tpu.memory_space<vmem>>, vector<4x1x8xf32>
    %171 = vector.broadcast %170 : vector<4x1x8xf32> to vector<4x8x8xf32>
    %172 = arith.addf %169, %171 : vector<4x8x8xf32>
    %c0_75 = arith.constant 0 : index
    %c0_76 = arith.constant 0 : index
    %c0_77 = arith.constant 0 : index
    %173 = vector.load %arg22[%c0_75, %c0_76, %c0_77] : memref<4x32x8xf32, #tpu.memory_space<vmem>>, vector<4x32x8xf32>
    "tpu.trace_start"() <{level = 10 : i32, message = "hsd,hde->hse"}> : () -> ()
    %cst_78 = arith.constant dense<0.000000e+00> : vector<4x8x8xf32>
    %174 = tpu.matmul %167, %173, %cst_78 {dimension_numbers = #tpu.dot_dimension_numbers<[2], [1], [1], [2], [0, 0, 0, 1, 1, 2], [0], [0]>} : vector<4x8x32xf32>, vector<4x32x8xf32>, vector<4x8x8xf32> -> vector<4x8x8xf32>
    "tpu.trace_stop"() : () -> ()
    %c0_79 = arith.constant 0 : index
    %c0_80 = arith.constant 0 : index
    %c0_81 = arith.constant 0 : index
    %175 = vector.load %arg23[%c0_79, %c0_80, %c0_81] : memref<4x1x8xf32, #tpu.memory_space<vmem>>, vector<4x1x8xf32>
    %176 = vector.broadcast %175 : vector<4x1x8xf32> to vector<4x8x8xf32>
    %177 = arith.addf %174, %176 : vector<4x8x8xf32>
    %c0_82 = arith.constant 0 : index
    %c0_83 = arith.constant 0 : index
    %c0_84 = arith.constant 0 : index
    %178 = vector.load %arg24[%c0_82, %c0_83, %c0_84] : memref<4x32x8xf32, #tpu.memory_space<vmem>>, vector<4x32x8xf32>
    "tpu.trace_start"() <{level = 10 : i32, message = "hsd,hde->hse"}> : () -> ()
    %cst_85 = arith.constant dense<0.000000e+00> : vector<4x8x8xf32>
    %179 = tpu.matmul %167, %178, %cst_85 {dimension_numbers = #tpu.dot_dimension_numbers<[2], [1], [1], [2], [0, 0, 0, 1, 1, 2], [0], [0]>} : vector<4x8x32xf32>, vector<4x32x8xf32>, vector<4x8x8xf32> -> vector<4x8x8xf32>
    "tpu.trace_stop"() : () -> ()
    %c0_86 = arith.constant 0 : index
    %c0_87 = arith.constant 0 : index
    %c0_88 = arith.constant 0 : index
    %180 = vector.load %arg25[%c0_86, %c0_87, %c0_88] : memref<4x1x8xf32, #tpu.memory_space<vmem>>, vector<4x1x8xf32>
    %181 = vector.broadcast %180 : vector<4x1x8xf32> to vector<4x8x8xf32>
    %182 = arith.addf %179, %181 : vector<4x8x8xf32>
    "tpu.trace_start"() <{level = 10 : i32, message = "hqe,hke->hqk"}> : () -> ()
    %cst_89 = arith.constant dense<0.000000e+00> : vector<4x8x8xf32>
    %183 = tpu.matmul %172, %177, %cst_89 {dimension_numbers = #tpu.dot_dimension_numbers<[2], [2], [1], [1], [0, 0, 0, 1, 1, 1], [0], [0]>} : vector<4x8x8xf32>, vector<4x8x8xf32>, vector<4x8x8xf32> -> vector<4x8x8xf32>
    "tpu.trace_stop"() : () -> ()
    %cst_90 = arith.constant 0.353553385 : f32
    %184 = vector.broadcast %cst_90 : f32 to vector<4x8x8xf32>
    %185 = arith.mulf %183, %184 : vector<4x8x8xf32>
    %cst_91 = arith.constant -1.000000e+30 : f32
    %186 = vector.shape_cast %61 : vector<1x8x8xi1> to vector<1x8x8xi1>
    %187 = vector.broadcast %186 : vector<1x8x8xi1> to vector<4x8x8xi1>
    %188 = vector.broadcast %cst_91 : f32 to vector<4x8x8xf32>
    %189 = arith.select %187, %185, %188 : vector<4x8x8xi1>, vector<4x8x8xf32>
    %cst_92 = arith.constant dense<0xFF800000> : vector<4x8xf32>
    %190 = vector.multi_reduction <maximumf>, %189, %cst_92 [2] : vector<4x8x8xf32> to vector<4x8xf32>
    %191 = vector.shape_cast %190 : vector<4x8xf32> to vector<4x8x1xf32>
    %192 = vector.broadcast %191 : vector<4x8x1xf32> to vector<4x8x8xf32>
    %193 = arith.subf %189, %192 : vector<4x8x8xf32>
    %194 = math.exp %193 : vector<4x8x8xf32>
    %cst_93 = arith.constant dense<0.000000e+00> : vector<4x8xf32>
    %195 = vector.multi_reduction <add>, %194, %cst_93 [2] : vector<4x8x8xf32> to vector<4x8xf32>
    %196 = vector.shape_cast %195 : vector<4x8xf32> to vector<4x8x1xf32>
    %197 = tpu.reciprocal %196 {approx = true} : vector<4x8x1xf32> -> vector<4x8x1xf32>
    %198 = vector.broadcast %197 : vector<4x8x1xf32> to vector<4x8x8xf32>
    %199 = arith.mulf %194, %198 : vector<4x8x8xf32>
    "tpu.trace_start"() <{level = 10 : i32, message = "hqk,hke->hqe"}> : () -> ()
    %cst_94 = arith.constant dense<0.000000e+00> : vector<4x8x8xf32>
    %200 = tpu.matmul %199, %182, %cst_94 {dimension_numbers = #tpu.dot_dimension_numbers<[2], [1], [1], [2], [0, 0, 0, 1, 1, 2], [0], [0]>} : vector<4x8x8xf32>, vector<4x8x8xf32>, vector<4x8x8xf32> -> vector<4x8x8xf32>
    "tpu.trace_stop"() : () -> ()
    %c0_95 = arith.constant 0 : index
    %c0_96 = arith.constant 0 : index
    %c0_97 = arith.constant 0 : index
    %201 = vector.load %arg26[%c0_95, %c0_96, %c0_97] : memref<4x8x32xf32, #tpu.memory_space<vmem>>, vector<4x8x32xf32>
    "tpu.trace_start"() <{level = 10 : i32, message = "hse,hed->hsd"}> : () -> ()
    %cst_98 = arith.constant dense<0.000000e+00> : vector<4x8x32xf32>
    %202 = tpu.matmul %200, %201, %cst_98 {dimension_numbers = #tpu.dot_dimension_numbers<[2], [1], [1], [2], [0, 0, 0, 1, 1, 2], [0], [0]>} : vector<4x8x8xf32>, vector<4x8x32xf32>, vector<4x8x32xf32> -> vector<4x8x32xf32>
    "tpu.trace_stop"() : () -> ()
    %cst_99 = arith.constant dense<0.000000e+00> : vector<8x32xf32>
    %203 = vector.multi_reduction <add>, %202, %cst_99 [0] : vector<4x8x32xf32> to vector<8x32xf32>
    %c0_100 = arith.constant 0 : index
    %c0_101 = arith.constant 0 : index
    %204 = vector.load %arg27[%c0_100, %c0_101] : memref<1x32xf32, #tpu.memory_space<vmem>>, vector<1x32xf32>
    %205 = vector.broadcast %204 : vector<1x32xf32> to vector<8x32xf32>
    %206 = arith.addf %203, %205 : vector<8x32xf32>
    %c0_102 = arith.constant 0 : index
    %c0_103 = arith.constant 0 : index
    %207 = vector.load %arg28[%c0_102, %c0_103] : memref<1x32xf32, #tpu.memory_space<vmem>>, vector<1x32xf32>
    %c0_104 = arith.constant 0 : index
    %c0_105 = arith.constant 0 : index
    %208 = vector.load %arg29[%c0_104, %c0_105] : memref<1x32xf32, #tpu.memory_space<vmem>>, vector<1x32xf32>
    %cst_106 = arith.constant dense<0.000000e+00> : vector<8xf32>
    %209 = vector.multi_reduction <add>, %206, %cst_106 [1] : vector<8x32xf32> to vector<8xf32>
    %210 = vector.shape_cast %209 : vector<8xf32> to vector<8x1xf32>
    %cst_107 = arith.constant 3.200000e+01 : f32
    %211 = vector.broadcast %cst_107 : f32 to vector<8x1xf32>
    %212 = arith.divf %210, %211 : vector<8x1xf32>
    %213 = vector.broadcast %212 : vector<8x1xf32> to vector<8x32xf32>
    %214 = arith.subf %206, %213 : vector<8x32xf32>
    %215 = arith.mulf %214, %214 : vector<8x32xf32>
    %cst_108 = arith.constant dense<0.000000e+00> : vector<8xf32>
    %216 = vector.multi_reduction <add>, %215, %cst_108 [1] : vector<8x32xf32> to vector<8xf32>
    %217 = vector.shape_cast %216 : vector<8xf32> to vector<8x1xf32>
    %cst_109 = arith.constant 3.200000e+01 : f32
    %218 = vector.broadcast %cst_109 : f32 to vector<8x1xf32>
    %219 = arith.divf %217, %218 : vector<8x1xf32>
    %220 = vector.broadcast %212 : vector<8x1xf32> to vector<8x32xf32>
    %221 = arith.subf %206, %220 : vector<8x32xf32>
    %cst_110 = arith.constant 9.99999974E-6 : f32
    %222 = vector.broadcast %cst_110 : f32 to vector<8x1xf32>
    %223 = arith.addf %219, %222 : vector<8x1xf32>
    %224 = math.rsqrt %223 : vector<8x1xf32>
    %225 = vector.broadcast %224 : vector<8x1xf32> to vector<8x32xf32>
    %226 = arith.mulf %221, %225 : vector<8x32xf32>
    %227 = vector.broadcast %207 : vector<1x32xf32> to vector<8x32xf32>
    %228 = arith.mulf %226, %227 : vector<8x32xf32>
    %229 = vector.broadcast %208 : vector<1x32xf32> to vector<8x32xf32>
    %230 = arith.addf %228, %229 : vector<8x32xf32>
    %c0_111 = arith.constant 0 : index
    %c0_112 = arith.constant 0 : index
    %231 = vector.load %arg30[%c0_111, %c0_112] : memref<32x64xf32, #tpu.memory_space<vmem>>, vector<32x64xf32>
    %cst_113 = arith.constant dense<0.000000e+00> : vector<8x64xf32>
    %232 = tpu.matmul %230, %231, %cst_113 {dimension_numbers = #tpu.dot_dimension_numbers<[1], [0], [0], [1], [0, 0, 1, 1], [], []>} : vector<8x32xf32>, vector<32x64xf32>, vector<8x64xf32> -> vector<8x64xf32>
    %c0_114 = arith.constant 0 : index
    %c0_115 = arith.constant 0 : index
    %233 = vector.load %arg31[%c0_114, %c0_115] : memref<1x64xf32, #tpu.memory_space<vmem>>, vector<1x64xf32>
    %234 = vector.broadcast %233 : vector<1x64xf32> to vector<8x64xf32>
    %235 = arith.addf %232, %234 : vector<8x64xf32>
    %cst_116 = arith.constant 0.000000e+00 : f32
    %236 = vector.broadcast %cst_116 : f32 to vector<8x64xf32>
    %237 = arith.maximumf %235, %236 : vector<8x64xf32>
    %c0_117 = arith.constant 0 : index
    %c0_118 = arith.constant 0 : index
    %238 = vector.load %arg32[%c0_117, %c0_118] : memref<64x32xf32, #tpu.memory_space<vmem>>, vector<64x32xf32>
    %cst_119 = arith.constant dense<0.000000e+00> : vector<8x32xf32>
    %239 = tpu.matmul %237, %238, %cst_119 {dimension_numbers = #tpu.dot_dimension_numbers<[1], [0], [0], [1], [0, 0, 1, 1], [], []>} : vector<8x64xf32>, vector<64x32xf32>, vector<8x32xf32> -> vector<8x32xf32>
    %c0_120 = arith.constant 0 : index
    %c0_121 = arith.constant 0 : index
    %240 = vector.load %arg33[%c0_120, %c0_121] : memref<1x32xf32, #tpu.memory_space<vmem>>, vector<1x32xf32>
    %241 = vector.broadcast %240 : vector<1x32xf32> to vector<8x32xf32>
    %242 = arith.addf %239, %241 : vector<8x32xf32>
    %243 = arith.addf %230, %242 : vector<8x32xf32>
    %c0_122 = arith.constant 0 : index
    %c0_123 = arith.constant 0 : index
    %244 = vector.load %arg34[%c0_122, %c0_123] : memref<1x32xf32, #tpu.memory_space<vmem>>, vector<1x32xf32>
    %c0_124 = arith.constant 0 : index
    %c0_125 = arith.constant 0 : index
    %245 = vector.load %arg35[%c0_124, %c0_125] : memref<1x32xf32, #tpu.memory_space<vmem>>, vector<1x32xf32>
    %cst_126 = arith.constant dense<0.000000e+00> : vector<8xf32>
    %246 = vector.multi_reduction <add>, %243, %cst_126 [1] : vector<8x32xf32> to vector<8xf32>
    %247 = vector.shape_cast %246 : vector<8xf32> to vector<8x1xf32>
    %cst_127 = arith.constant 3.200000e+01 : f32
    %248 = vector.broadcast %cst_127 : f32 to vector<8x1xf32>
    %249 = arith.divf %247, %248 : vector<8x1xf32>
    %250 = vector.broadcast %249 : vector<8x1xf32> to vector<8x32xf32>
    %251 = arith.subf %243, %250 : vector<8x32xf32>
    %252 = arith.mulf %251, %251 : vector<8x32xf32>
    %cst_128 = arith.constant dense<0.000000e+00> : vector<8xf32>
    %253 = vector.multi_reduction <add>, %252, %cst_128 [1] : vector<8x32xf32> to vector<8xf32>
    %254 = vector.shape_cast %253 : vector<8xf32> to vector<8x1xf32>
    %cst_129 = arith.constant 3.200000e+01 : f32
    %255 = vector.broadcast %cst_129 : f32 to vector<8x1xf32>
    %256 = arith.divf %254, %255 : vector<8x1xf32>
    %257 = vector.broadcast %249 : vector<8x1xf32> to vector<8x32xf32>
    %258 = arith.subf %243, %257 : vector<8x32xf32>
    %cst_130 = arith.constant 9.99999974E-6 : f32
    %259 = vector.broadcast %cst_130 : f32 to vector<8x1xf32>
    %260 = arith.addf %256, %259 : vector<8x1xf32>
    %261 = math.rsqrt %260 : vector<8x1xf32>
    %262 = vector.broadcast %261 : vector<8x1xf32> to vector<8x32xf32>
    %263 = arith.mulf %258, %262 : vector<8x32xf32>
    %264 = vector.broadcast %244 : vector<1x32xf32> to vector<8x32xf32>
    %265 = arith.mulf %263, %264 : vector<8x32xf32>
    %266 = vector.broadcast %245 : vector<1x32xf32> to vector<8x32xf32>
    %267 = arith.addf %265, %266 : vector<8x32xf32>
    %c0_131 = arith.constant 0 : index
    %c0_132 = arith.constant 0 : index
    %268 = vector.load %arg36[%c0_131, %c0_132] : memref<32x128xf32, #tpu.memory_space<vmem>>, vector<32x128xf32>
    %cst_133 = arith.constant dense<0.000000e+00> : vector<8x128xf32>
    %269 = tpu.matmul %267, %268, %cst_133 {dimension_numbers = #tpu.dot_dimension_numbers<[1], [0], [0], [1], [0, 0, 1, 1], [], []>} : vector<8x32xf32>, vector<32x128xf32>, vector<8x128xf32> -> vector<8x128xf32>
    %c0_134 = arith.constant 0 : index
    %c0_135 = arith.constant 0 : index
    %270 = vector.load %arg37[%c0_134, %c0_135] : memref<1x128xf32, #tpu.memory_space<vmem>>, vector<1x128xf32>
    %271 = vector.broadcast %270 : vector<1x128xf32> to vector<8x128xf32>
    %272 = arith.addf %269, %271 : vector<8x128xf32>
    %c0_136 = arith.constant 0 : index
    %c0_137 = arith.constant 0 : index
    %c0_138 = arith.constant 0 : index
    %273 = vector.load %arg38[%c0_136, %c0_137, %c0_138] : memref<1x8x128xf32, #tpu.memory_space<vmem>>, vector<1x8x128xf32>
    %274 = vector.shape_cast %273 : vector<1x8x128xf32> to vector<8x128xf32>
    %275 = vector.shape_cast %272 : vector<8x128xf32> to vector<1x8x128xf32>
    tpu.vector_store %arg38[%c0_136, %c0_137, %c0_138], %275 {strides = array<i32>} : memref<1x8x128xf32, #tpu.memory_space<vmem>>, vector<1x8x128xf32>,
    return
  }
  func.func @transform_0(%arg0: i32, %arg1: memref<2x8xi32, #tpu.memory_space<smem>>) -> (i32, i32) {
    %c0_i32 = arith.constant 0 : i32
    %c0_i32_0 = arith.constant 0 : i32
    %c0_i32_1 = arith.constant 0 : i32
    return %c0_i32, %c0_i32_0 : i32, i32
  }
  func.func @transform_1(%arg0: i32, %arg1: memref<2x8xi32, #tpu.memory_space<smem>>) -> (i32, i32) {
    %c0_i32 = arith.constant 0 : i32
    %c0_i32_0 = arith.constant 0 : i32
    %c0_i32_1 = arith.constant 0 : i32
    return %c0_i32, %c0_i32_0 : i32, i32
  }
  func.func @transform_2(%arg0: i32, %arg1: memref<2x8xi32, #tpu.memory_space<smem>>) -> (i32, i32, i32) {
    %c0_i32 = arith.constant 0 : i32
    %c0_i32_0 = arith.constant 0 : i32
    %c0_i32_1 = arith.constant 0 : i32
    %c0_i32_2 = arith.constant 0 : i32
    return %c0_i32, %c0_i32_0, %c0_i32_1 : i32, i32, i32
  }
  func.func @transform_3(%arg0: i32, %arg1: memref<2x8xi32, #tpu.memory_space<smem>>) -> (i32, i32, i32) {
    %c0_i32 = arith.constant 0 : i32
    %c0_i32_0 = arith.constant 0 : i32
    %c0_i32_1 = arith.constant 0 : i32
    %c0_i32_2 = arith.constant 0 : i32
    return %c0_i32, %c0_i32_0, %c0_i32_1 : i32, i32, i32
  }
  func.func @transform_4(%arg0: i32, %arg1: memref<2x8xi32, #tpu.memory_space<smem>>) -> (i32, i32, i32) {
    %c0_i32 = arith.constant 0 : i32
    %c0_i32_0 = arith.constant 0 : i32
    %c0_i32_1 = arith.constant 0 : i32
    %c0_i32_2 = arith.constant 0 : i32
    return %c0_i32, %c0_i32_0, %c0_i32_1 : i32, i32, i32
  }
  func.func @transform_5(%arg0: i32, %arg1: memref<2x8xi32, #tpu.memory_space<smem>>) -> (i32, i32, i32) {
    %c0_i32 = arith.constant 0 : i32
    %c0_i32_0 = arith.constant 0 : i32
    %c0_i32_1 = arith.constant 0 : i32
    %c0_i32_2 = arith.constant 0 : i32
    return %c0_i32, %c0_i32_0, %c0_i32_1 : i32, i32, i32
  }
  func.func @transform_6(%arg0: i32, %arg1: memref<2x8xi32, #tpu.memory_space<smem>>) -> (i32, i32, i32) {
    %c0_i32 = arith.constant 0 : i32
    %c0_i32_0 = arith.constant 0 : i32
    %c0_i32_1 = arith.constant 0 : i32
    %c0_i32_2 = arith.constant 0 : i32
    return %c0_i32, %c0_i32_0, %c0_i32_1 : i32, i32, i32
  }
  func.func @transform_7(%arg0: i32, %arg1: memref<2x8xi32, #tpu.memory_space<smem>>) -> (i32, i32, i32) {
    %c0_i32 = arith.constant 0 : i32
    %c0_i32_0 = arith.constant 0 : i32
    %c0_i32_1 = arith.constant 0 : i32
    %c0_i32_2 = arith.constant 0 : i32
    return %c0_i32, %c0_i32_0, %c0_i32_1 : i32, i32, i32
  }
  func.func @transform_8(%arg0: i32, %arg1: memref<2x8xi32, #tpu.memory_space<smem>>) -> (i32, i32, i32) {
    %c0_i32 = arith.constant 0 : i32
    %c0_i32_0 = arith.constant 0 : i32
    %c0_i32_1 = arith.constant 0 : i32
    %c0_i32_2 = arith.constant 0 : i32
    return %c0_i32, %c0_i32_0, %c0_i32_1 : i32, i32, i32
  }
  func.func @transform_9(%arg0: i32, %arg1: memref<2x8xi32, #tpu.memory_space<smem>>) -> (i32, i32) {
    %c0_i32 = arith.constant 0 : i32
    %c0_i32_0 = arith.constant 0 : i32
    %c0_i32_1 = arith.constant 0 : i32
    return %c0_i32, %c0_i32_0 : i32, i32
  }
  func.func @transform_10(%arg0: i32, %arg1: memref<2x8xi32, #tpu.memory_space<smem>>) -> (i32, i32) {
    %c0_i32 = arith.constant 0 : i32
    %c0_i32_0 = arith.constant 0 : i32
    %c0_i32_1 = arith.constant 0 : i32
    return %c0_i32, %c0_i32_0 : i32, i32
  }
  func.func @transform_11(%arg0: i32, %arg1: memref<2x8xi32, #tpu.memory_space<smem>>) -> (i32, i32) {
    %c0_i32 = arith.constant 0 : i32
    %c0_i32_0 = arith.constant 0 : i32
    %c0_i32_1 = arith.constant 0 : i32
    return %c0_i32, %c0_i32_0 : i32, i32
  }
  func.func @transform_12(%arg0: i32, %arg1: memref<2x8xi32, #tpu.memory_space<smem>>) -> (i32, i32) {
    %c0_i32 = arith.constant 0 : i32
    %c0_i32_0 = arith.constant 0 : i32
    %c0_i32_1 = arith.constant 0 : i32
    return %c0_i32, %c0_i32_0 : i32, i32
  }
  func.func @transform_13(%arg0: i32, %arg1: memref<2x8xi32, #tpu.memory_space<smem>>) -> (i32, i32) {
    %c0_i32 = arith.constant 0 : i32
    %c0_i32_0 = arith.constant 0 : i32
    %c0_i32_1 = arith.constant 0 : i32
    return %c0_i32, %c0_i32_0 : i32, i32
  }
  func.func @transform_14(%arg0: i32, %arg1: memref<2x8xi32, #tpu.memory_space<smem>>) -> (i32, i32) {
    %c0_i32 = arith.constant 0 : i32
    %c0_i32_0 = arith.constant 0 : i32
    %c0_i32_1 = arith.constant 0 : i32
    return %c0_i32, %c0_i32_0 : i32, i32
  }
  func.func @transform_15(%arg0: i32, %arg1: memref<2x8xi32, #tpu.memory_space<smem>>) -> (i32, i32) {
    %c0_i32 = arith.constant 0 : i32
    %c0_i32_0 = arith.constant 0 : i32
    %c0_i32_1 = arith.constant 0 : i32
    return %c0_i32, %c0_i32_0 : i32, i32
  }
  func.func @transform_16(%arg0: i32, %arg1: memref<2x8xi32, #tpu.memory_space<smem>>) -> (i32, i32) {
    %c0_i32 = arith.constant 0 : i32
    %c0_i32_0 = arith.constant 0 : i32
    %c0_i32_1 = arith.constant 0 : i32
    return %c0_i32, %c0_i32_0 : i32, i32
  }
  func.func @transform_17(%arg0: i32, %arg1: memref<2x8xi32, #tpu.memory_space<smem>>) -> (i32, i32) {
    %c0_i32 = arith.constant 0 : i32
    %c0_i32_0 = arith.constant 0 : i32
    %c0_i32_1 = arith.constant 0 : i32
    return %c0_i32, %c0_i32_0 : i32, i32
  }
  func.func @transform_18(%arg0: i32, %arg1: memref<2x8xi32, #tpu.memory_space<smem>>) -> (i32, i32, i32) {
    %c0_i32 = arith.constant 0 : i32
    %c0_i32_0 = arith.constant 0 : i32
    %c0_i32_1 = arith.constant 0 : i32
    %c0_i32_2 = arith.constant 0 : i32
    return %c0_i32, %c0_i32_0, %c0_i32_1 : i32, i32, i32
  }
  func.func @transform_19(%arg0: i32, %arg1: memref<2x8xi32, #tpu.memory_space<smem>>) -> (i32, i32, i32) {
    %c0_i32 = arith.constant 0 : i32
    %c0_i32_0 = arith.constant 0 : i32
    %c0_i32_1 = arith.constant 0 : i32
    %c0_i32_2 = arith.constant 0 : i32
    return %c0_i32, %c0_i32_0, %c0_i32_1 : i32, i32, i32
  }
  func.func @transform_20(%arg0: i32, %arg1: memref<2x8xi32, #tpu.memory_space<smem>>) -> (i32, i32, i32) {
    %c0_i32 = arith.constant 0 : i32
    %c0_i32_0 = arith.constant 0 : i32
    %c0_i32_1 = arith.constant 0 : i32
    %c0_i32_2 = arith.constant 0 : i32
    return %c0_i32, %c0_i32_0, %c0_i32_1 : i32, i32, i32
  }
  func.func @transform_21(%arg0: i32, %arg1: memref<2x8xi32, #tpu.memory_space<smem>>) -> (i32, i32, i32) {
    %c0_i32 = arith.constant 0 : i32
    %c0_i32_0 = arith.constant 0 : i32
    %c0_i32_1 = arith.constant 0 : i32
    %c0_i32_2 = arith.constant 0 : i32
    return %c0_i32, %c0_i32_0, %c0_i32_1 : i32, i32, i32
  }
  func.func @transform_22(%arg0: i32, %arg1: memref<2x8xi32, #tpu.memory_space<smem>>) -> (i32, i32, i32) {
    %c0_i32 = arith.constant 0 : i32
    %c0_i32_0 = arith.constant 0 : i32
    %c0_i32_1 = arith.constant 0 : i32
    %c0_i32_2 = arith.constant 0 : i32
    return %c0_i32, %c0_i32_0, %c0_i32_1 : i32, i32, i32
  }
  func.func @transform_23(%arg0: i32, %arg1: memref<2x8xi32, #tpu.memory_space<smem>>) -> (i32, i32, i32) {
    %c0_i32 = arith.constant 0 : i32
    %c0_i32_0 = arith.constant 0 : i32
    %c0_i32_1 = arith.constant 0 : i32
    %c0_i32_2 = arith.constant 0 : i32
    return %c0_i32, %c0_i32_0, %c0_i32_1 : i32, i32, i32
  }
  func.func @transform_24(%arg0: i32, %arg1: memref<2x8xi32, #tpu.memory_space<smem>>) -> (i32, i32, i32) {
    %c0_i32 = arith.constant 0 : i32
    %c0_i32_0 = arith.constant 0 : i32
    %c0_i32_1 = arith.constant 0 : i32
    %c0_i32_2 = arith.constant 0 : i32
    return %c0_i32, %c0_i32_0, %c0_i32_1 : i32, i32, i32
  }
  func.func @transform_25(%arg0: i32, %arg1: memref<2x8xi32, #tpu.memory_space<smem>>) -> (i32, i32) {
    %c0_i32 = arith.constant 0 : i32
    %c0_i32_0 = arith.constant 0 : i32
    %c0_i32_1 = arith.constant 0 : i32
    return %c0_i32, %c0_i32_0 : i32, i32
  }
  func.func @transform_26(%arg0: i32, %arg1: memref<2x8xi32, #tpu.memory_space<smem>>) -> (i32, i32) {
    %c0_i32 = arith.constant 0 : i32
    %c0_i32_0 = arith.constant 0 : i32
    %c0_i32_1 = arith.constant 0 : i32
    return %c0_i32, %c0_i32_0 : i32, i32
  }
  func.func @transform_27(%arg0: i32, %arg1: memref<2x8xi32, #tpu.memory_space<smem>>) -> (i32, i32) {
    %c0_i32 = arith.constant 0 : i32
    %c0_i32_0 = arith.constant 0 : i32
    %c0_i32_1 = arith.constant 0 : i32
    return %c0_i32, %c0_i32_0 : i32, i32
  }
  func.func @transform_28(%arg0: i32, %arg1: memref<2x8xi32, #tpu.memory_space<smem>>) -> (i32, i32) {
    %c0_i32 = arith.constant 0 : i32
    %c0_i32_0 = arith.constant 0 : i32
    %c0_i32_1 = arith.constant 0 : i32
    return %c0_i32, %c0_i32_0 : i32, i32
  }
  func.func @transform_29(%arg0: i32, %arg1: memref<2x8xi32, #tpu.memory_space<smem>>) -> (i32, i32) {
    %c0_i32 = arith.constant 0 : i32
    %c0_i32_0 = arith.constant 0 : i32
    %c0_i32_1 = arith.constant 0 : i32
    return %c0_i32, %c0_i32_0 : i32, i32
  }
  func.func @transform_30(%arg0: i32, %arg1: memref<2x8xi32, #tpu.memory_space<smem>>) -> (i32, i32) {
    %c0_i32 = arith.constant 0 : i32
    %c0_i32_0 = arith.constant 0 : i32
    %c0_i32_1 = arith.constant 0 : i32
    return %c0_i32, %c0_i32_0 : i32, i32
  }
  func.func @transform_31(%arg0: i32, %arg1: memref<2x8xi32, #tpu.memory_space<smem>>) -> (i32, i32) {
    %c0_i32 = arith.constant 0 : i32
    %c0_i32_0 = arith.constant 0 : i32
    %c0_i32_1 = arith.constant 0 : i32
    return %c0_i32, %c0_i32_0 : i32, i32
  }
  func.func @transform_32(%arg0: i32, %arg1: memref<2x8xi32, #tpu.memory_space<smem>>) -> (i32, i32) {
    %c0_i32 = arith.constant 0 : i32
    %c0_i32_0 = arith.constant 0 : i32
    %c0_i32_1 = arith.constant 0 : i32
    return %c0_i32, %c0_i32_0 : i32, i32
  }
  func.func @transform_33(%arg0: i32, %arg1: memref<2x8xi32, #tpu.memory_space<smem>>) -> (i32, i32) {
    %c0_i32 = arith.constant 0 : i32
    %c0_i32_0 = arith.constant 0 : i32
    %c0_i32_1 = arith.constant 0 : i32
    return %c0_i32, %c0_i32_0 : i32, i32
  }
  func.func @transform_34(%arg0: i32, %arg1: memref<2x8xi32, #tpu.memory_space<smem>>) -> (i32, i32) {
    %c0_i32 = arith.constant 0 : i32
    %c0_i32_0 = arith.constant 0 : i32
    %c0_i32_1 = arith.constant 0 : i32
    return %c0_i32, %c0_i32_0 : i32, i32
  }
  func.func @transform_35(%arg0: i32, %arg1: memref<2x8xi32, #tpu.memory_space<smem>>) -> (i32, i32) {
    %c0_i32 = arith.constant 0 : i32
    %c0_i32_0 = arith.constant 0 : i32
    %c0_i32_1 = arith.constant 0 : i32
    return %c0_i32, %c0_i32_0 : i32, i32
  }
  func.func @transform_36(%arg0: i32, %arg1: memref<2x8xi32, #tpu.memory_space<smem>>) -> (i32, i32, i32) {
    %c0_i32 = arith.constant 0 : i32
    %c0_i32_0 = arith.constant 0 : i32
    %c0_i32_1 = arith.constant 0 : i32
    return %arg0, %c0_i32, %c0_i32_0 : i32, i32, i32
  }
}

</mosaic_0001>

<bundles_post_ra>
// kernel: tpu_custom_call.1
= control target key start
LH: loop header
LB: loop body
LE: loop exit
PB: predicated region body
PF: predicated region fallthrough
CT: control target
= control target key end

     0   :  { %s6703_s6 = smov 1   ;;  %s6704_s10 = smov 2   ;;  %s7629_s0 = inlined_call_operand.smem [shape: u32[38], index: -1, kind: input, shape index: {}] }
   0x1   :  { %s6752_s5 = sld [smem:[%s7629_s0]]   ;;  %s6705_s14 = smov 3  }
   0x2   :  { %s6757_s9 = sld [smem:[%s7629_s0 + %s6703_s6]]   ;;  %s6706_s18 = smov 4  }
   0x3   :  { %s6762_s13 = sld [smem:[%s7629_s0 + %s6704_s10]]   ;;  %s6707_s22 = smov 5  }
   0x4   :  { %s6767_s17 = sld [smem:[%s7629_s0 + %s6705_s14]]   ;;  %s6708_s26 = smov 6  }
   0x5   :  { %s6772_s21 = sld [smem:[%s7629_s0 + %s6706_s18]]   ;;  %s6709_s30 = smov 7  }
   0x6   :  { %s6777_s25 = sld [smem:[%s7629_s0 + %s6707_s22]]   ;;  %s6710_s4 = smov 8  }
   0x7   :  { %s6782_s29 = sld [smem:[%s7629_s0 + %s6708_s26]]   ;;  %s6711_s10 = smov 9  }
   0x8   :  { %7652 = sst [smem:[#allocation8_spill]] %s6757_s9  ;;  %s6712_s15 = smov 10  }
   0x9   :  { %7653 = sst [smem:[#allocation9_spill]] %s6762_s13  ;;  %s6713_s20 = smov 11  }
   0xa   :  { %s6787_s3 = sld [smem:[%s7629_s0 + %s6709_s30]]   ;;  %s6714_s26 = smov 12  }
   0xb   :  { %s6792_s8 = sld [smem:[%s7629_s0 + %s6710_s4]]   ;;  %s6715_s1 = smov 13  }
   0xc   :  { %s6797_s14 = sld [smem:[%s7629_s0 + %s6711_s10]]   ;;  %s6716_s7 = smov 14  }
   0xd   :  { %s6802_s19 = sld [smem:[%s7629_s0 + %s6712_s15]]   ;;  %s6717_s15 = smov 15  }
   0xe   :  { %s6807_s24 = sld [smem:[%s7629_s0 + %s6713_s20]]   ;;  %s6718_s22 = smov 16  }
   0xf   :  { %s6812_s30 = sld [smem:[%s7629_s0 + %s6714_s26]]   ;;  %s6719_s28 = smov 17  }
  0x10   :  { %7654 = sst [smem:[#allocation10_spill]] %s6787_s3 }
  0x11   :  { %7655 = sst [smem:[#allocation11_spill]] %s6792_s8 }
  0x12   :  { %s6817_s6 = sld [smem:[%s7629_s0 + %s6715_s1]]  }
  0x13   :  { %s6822_s12 = sld [smem:[%s7629_s0 + %s6716_s7]]   ;;  %s6720_s7 = smov 18  }
  0x14   :  { %s6827_s20 = sld [smem:[%s7629_s0 + %s6717_s15]]   ;;  %s6721_s15 = smov 19  }
  0x15   :  { %7656 = sst [smem:[#allocation12_spill]] %s6812_s30 }
  0x16   :  { %s6832_s27 = sld [smem:[%s7629_s0 + %s6718_s22]]   ;;  %s6722_s22 = smov 20  }
  0x17   :  { %s6837_s4 = sld [smem:[%s7629_s0 + %s6719_s28]]   ;;  %s6723_s28 = smov 21  }
  0x18   :  { %7657 = sst [smem:[#allocation13_spill]] %s6817_s6 }
  0x19   :  { %7658 = sst [smem:[#allocation14_spill]] %s6822_s12 }
  0x1a   :  { %s6842_s12 = sld [smem:[%s7629_s0 + %s6720_s7]]   ;;  %s6724_s7 = smov 22  }
  0x1b   :  { %s6847_s30 = sld [smem:[%s7629_s0 + %s6721_s15]]   ;;  %s6725_s15 = smov 23  }
  0x1c   :  { %7659 = sst [smem:[#allocation15_spill]] %s6832_s27 }
  0x1d   :  { %7660 = sst [smem:[#allocation16_spill]] %s6837_s4 }
  0x1e   :  { %s6852_s27 = sld [smem:[%s7629_s0 + %s6722_s22]]   ;;  %s6726_s22 = smov 24  }
  0x1f   :  { %s6857_s4 = sld [smem:[%s7629_s0 + %s6723_s28]]   ;;  %s6727_s28 = smov 25  }
  0x20   :  { %7661 = sst [smem:[#allocation17_spill]] %s6842_s12 }
  0x21   :  { %7662 = sst [smem:[#allocation18_spill]] %s6847_s30 }
  0x22   :  { %s6862_s12 = sld [smem:[%s7629_s0 + %s6724_s7]]   ;;  %s6728_s7 = smov 26  }
  0x23   :  { %s6867_s30 = sld [smem:[%s7629_s0 + %s6725_s15]]   ;;  %s6729_s15 = smov 27  }
  0x24   :  { %7663 = sst [smem:[#allocation19_spill]] %s6852_s27 }
  0x25   :  { %7664 = sst [smem:[#allocation20_spill]] %s6857_s4 }
  0x26   :  { %s6872_s27 = sld [smem:[%s7629_s0 + %s6726_s22]]   ;;  %s6730_s22 = smov 28  }
  0x27   :  { %s6877_s4 = sld [smem:[%s7629_s0 + %s6727_s28]]   ;;  %s6731_s28 = smov 29  }
  0x28   :  { %7665 = sst [smem:[#allocation21_spill]] %s6862_s12 }
  0x29   :  { %7666 = sst [smem:[#allocation22_spill]] %s6867_s30 }
  0x2a   :  { %s6882_s12 = sld [smem:[%s7629_s0 + %s6728_s7]]   ;;  %s6732_s7 = smov 30  }
  0x2b   :  { %s6887_s30 = sld [smem:[%s7629_s0 + %s6729_s15]]   ;;  %s6733_s15 = smov 31  }
  0x2c   :  { %7667 = sst [smem:[#allocation23_spill]] %s6872_s27 }
  0x2d   :  { %7668 = sst [smem:[#allocation24_spill]] %s6877_s4  ;;  %s6735_s4 = smov 33  }
  0x2e   :  { %s6892_s1 = sld [smem:[%s7629_s0 + %s6730_s22]]   ;;  %s6734_s22 = smov 32  }
  0x2f   :  { %s6897_s10 = sld [smem:[%s7629_s0 + %s6731_s28]]  }
  0x30   :  { %7669 = sst [smem:[#allocation25_spill]] %s6882_s12  ;;  %s6736_s12 = smov 34  }
  0x31   :  { %7670 = sst [smem:[#allocation26_spill]] %s6887_s30  ;;  %s6737_s30 = smov 35  }
  0x32   :  { %s6902_s16 = sld [smem:[%s7629_s0 + %s6732_s7]]  }
  0x33   :  { %s6907_s23 = sld [smem:[%s7629_s0 + %s6733_s15]]  }
  0x34   :  { %7671 = sst [smem:[#allocation27_spill]] %s6892_s1  ;;  %s80_s1 = sshll.u32 %s6752_s5, 4  ;;  %s81_s1 = int_to_ptr.vmem [resolvable:$true] %s80_s1 }
  0x35   :  { %7672 = sst [smem:[#allocation28_spill]] %s6897_s10  ;;  %s6627_s7 = scalar_lea.vmem %s81_s1, 32 }
  0x36   :  { %s6912_s27 = sld [smem:[%s7629_s0 + %s6734_s22]]   ;;  %s6738_s22 = smov 36  }
  0x37   :  { %s6917_s10 = sld [smem:[%s7629_s0 + %s6735_s4]]   ;;  %s6739_s4 = smov 37  }
  0x38   :  { %7673 = sst [smem:[#allocation29_spill]] %s6902_s16  ;;  %p6628_p0 = scmp.ne.s32.totalorder %s81_s1, %s6627_s7 }
  0x39   :  { %7674 = sst [smem:[#allocation30_spill]] %s6907_s23  ;;  %p6632_p1 = scmp.lt.s32.totalorder %s81_s1, %s81_s1 }
  0x3a   :  { %s6922_s16 = sld [smem:[%s7629_s0 + %s6736_s12]]   ;;  %p6633_p2 = scmp.lt.s32.totalorder %s6627_s7, %s6627_s7 }
  0x3b   :  { %s6927_s23 = sld [smem:[%s7629_s0 + %s6737_s30]]  }
  0x3c   :  { %7675 = sst [smem:[#allocation31_spill]] %s6912_s27  ;;  %p6634_p3 = por %p6633_p2, %p6632_p1 }
  0x3d   :  { %7676 = sst [smem:[#allocation32_spill]] %s6917_s10 }
  0x3e   :  { %s6933_s28 = sld [smem:[%s7629_s0 + %s6738_s22]]   ;;  %p6635_p4 = pnand %p6634_p3, %p6628_p0 }
  0x3f   :  { %s6938_s12 = sld [smem:[%s7629_s0 + %s6739_s4]]  }
  0x40   :  { %6638 = shalt.err (!%p6635_p4)  }
  0x41   :  { %s6740_s5 = smov [#allocation3]  }
  0x42   :  { %83 = dma.vmem_to_smem %s81_s1, 32, %s6740_s5, [#allocation2] }
  0x43   :  { %6681 = dma.done.wait [#allocation2], 32 }
  0x44   :  { %6682 = vsyncadd [#allocation2], 4294967264 }
  0x45   :  { %85 = sfence }
  0x46   :  { %86 = vsyncpa [#allocation5], 0 }
  0x47   :  { %88 = vsyncpa [#allocation5 + $0x1], 0  ;;  %s6940_s27 = smov 0   ;;  %s6942_s11 = smov 0  }
  0x48   :  { %s6944_s0 = smov 0   ;;  %s6946_s10 = smov 0  }
  0x49 LB: > { %s7677_s8 = sld [smem:[#allocation11_spill]]  ;;  %s5730_s30 = sadd.s32 4294967295, %s6701_s10   ;;  %s6701_s10 = sphi %s6946_s10, %s7713_s10   ;;  %s6697_s0 = sphi %s6944_s0, %s7715_s0   ;;  %s6693_s11 = sphi %s6942_s11, %s7717_s11   ;;  %s6689_s27 = sphi %s6940_s27, %s7716_s27  }
  0x4a   : > { %s7678_s6 = sld [smem:[#allocation13_spill]]  ;;  %s5731_s15 = sadd.s32 4294967294, %s6701_s10  }
  0x4b   : > { %s7679_s3 = sld [smem:[#allocation10_spill]]  ;;  %s6963_s18 = sadd.s32 1, %s6701_s10  }
  0x4c   : > { %s7680_s9 = sld [smem:[#allocation8_spill]]  ;;  %s857_s1 = sadd.s32 1, %s6697_s0 }
  0x4d   : > { %7681 = sst [smem:[#allocation33_spill]] %s6697_s0  ;;  %s854_s22 = ssub.s32 %s6701_s10, %s6963_s18 }
  0x4e   : > { %7682 = sst [smem:[#allocation34_spill]] %s6963_s18  ;;  %p867_p5 = scmp.ne.s32.totalorder %s6697_s0, %s6693_s11 }
  0x4f   : > { %p855_p6 = scmp.eq.s32.totalorder %s854_s22, 0  ;;  %p868_p7 = scmp.eq.s32.totalorder %s5730_s30, 1 }
  0x50   : > { %p873_p8 = scmp.ne.s32.totalorder %s6693_s11, %s6689_s27  ;;  %p874_p9 = scmp.eq.s32.totalorder %s5731_s15, 1 }
  0x51   : > { %s6973_s26 = scalar_select %p855_p6, %s6697_s0, %s857_s1  }
  0x52   : > { %p6975_p10 = por %p868_p7, %p867_p5  ;;  %p6979_p11 = por %p874_p9, %p873_p8 }
  0x53   : > { %7683 = sst [smem:[#allocation35_spill]] %s6973_s26  ;;  %p5733_p12 = scmp.ge.s32.totalorder %s6701_s10, 1 }
  0x54   : > { %s7685_s2 = scalar_select %p6979_p11, 1, 0 }
  0x55   : > { %p1000_p13 = scmp.lt.s32.totalorder %s6701_s10, 3 }
  0x56   : > { %7686 = sst [smem:[#allocation36_spill]] %s7685_s2 }
  0x57   : > { %p1001_p0 = pnand %p5733_p12, %p1000_p13 }
  0x58   : > { %s6986_s7 = sshll.u32 (!%p1001_p0), %s5730_s30, 7  ;;  %s7689_s13 = sld [smem:[#allocation9_spill]] (!%p1001_p0) }
  0x59   : > { %1004 = sbr.rel (%p1001_p0) target bundleno = 4798 (0x12be), region = 164  ;;  %s6993_s5 = sld [smem:[#allocation3 + %s6986_s7]] (!%p1001_p0) }
  0x5a   : > { %s1095_s15 = sadd.s32 (!%p1001_p0), 1, %s6986_s7  ;;  %s1100_s1 = sadd.s32 (!%p1001_p0), 2, %s6986_s7 }
  0x5b   : > { %s6997_s30 = sld [smem:[#allocation3 + %s1095_s15]] (!%p1001_p0)  ;;  %s1110_s0 = sadd.s32 (!%p1001_p0), 4, %s6986_s7 }
  0x5c   : > { %s7003_s22 = sld [smem:[#allocation3 + %s1100_s1]] (!%p1001_p0)  ;;  %s1115_s18 = sadd.s32 (!%p1001_p0), 5, %s6986_s7 }
  0x5d   : > { %s1111_s15 = sld [smem:[#allocation3 + %s1110_s0]] (!%p1001_p0)  ;;  %s1120_s2 = sadd.s32 (!%p1001_p0), 6, %s6986_s7 }
  0x5e   : > { %v1133_v0 = vld [vmem:[%s7680_s9 + $0x8] sm:$0xff]  ;;  %v1085_v1 = vlaneseq  ;;  %v6741_v2 = vmov 0.0   ;;  %v1132_v3 = vld [vmem:[%s7680_s9] sm:$0xff]  ;;  %vm6742_vm0 = vmmov 0   ;;  %v1213_v4 = vld [vmem:[%s6767_s17 + $0x18] sm:$0xff]  ;;  %s1105_s9 = sadd.s32 3, %s6986_s7 }
  0x5f   : > { %6046 = vmatprep.subr.mxu0 %v6741_v2  ;;  %6050 = vmatprep.mubr.msk.f32.mxu0 %vm6742_vm0, %v6741_v2  ;;  %v1212_v6 = vld [vmem:[%s6767_s17 + $0x10] sm:$0xff]  ;;  %s7006_s26 = sld [smem:[#allocation3 + %s1105_s9]]  ;;  %v1211_v8 = vld [vmem:[%s6767_s17 + $0x8] sm:$0xff]  ;;  %v1092_v10 = vstv %s6993_s5  ;;  %s1125_s0 = sadd.s32 7, %s6986_s7  ;;  %vm1135_vm10 = vcmask 130048   ;;  %v1217_v26 = vld [vmem:[%s6767_s17 + $0x38] sm:$0xff] }
  0x60   : > { %6047 = vmatpush3.msra.mxu0 %v1133_v0  ;;  %v1086_v5 = vshrl.u32 %v1085_v1, 7  ;;  %6053 = vmatprep.subr.mxu1 %v6741_v2  ;;  %v1088_v7 = vand.u32 127, %v1085_v1  ;;  %s1116_s1 = sld [smem:[#allocation3 + %s1115_s18]]  ;;  %v1216_v28 = vld [vmem:[%s6767_s17 + $0x30] sm:$0xff]  ;;  %v1215_v29 = vld [vmem:[%s6767_s17 + $0x28] sm:$0xff]  ;;  %v1210_v30 = vld [vmem:[%s6767_s17] sm:$0xff] }
  0x61   : > { %6048 = vmatprep.subr.mxu0 %v6741_v2  ;;  %6054 = vmatpush3.msra.mxu1 %v1213_v4  ;;  %s1121_s9 = sld [smem:[#allocation3 + %s1120_s2]]  ;;  %v1097_v12 = vstv %s6997_s30  ;;  %v1214_v31 = vld [vmem:[%s6767_s17 + $0x20] sm:$0xff]  ;;  %vm1254_vm12 = vcmask 261120   ;;  %v1221_v35 = vld [vmem:[%s6767_s17 + $0x58] sm:$0xff]  ;;  %v1220_v38 = vld [vmem:[%s6767_s17 + $0x50] sm:$0xff]  ;;  %vm2186_vm13 = vcmask 64512  }
  0x62   : > { %6049 = vmatpush3.msra.mxu0 %v1132_v3  ;;  %6055 = vmatprep.subr.mxu1 %v6741_v2  ;;  %vm1089_vm1 = vcmp.eq.s32.totalorder %v1086_v5, 0  ;;  %vm1094_vm2 = vcmp.eq.s32.totalorder %v1086_v5, 1  ;;  %vm7014_vm3 = vcmp.le.s32.totalorder %v1088_v7, %v1086_v5  ;;  %vm1099_vm4 = vcmp.eq.s32.totalorder %v1086_v5, 2  ;;  %s1126_s18 = sld [smem:[#allocation3 + %s1125_s0]]  ;;  %v1134_v32 = vld [vmem:[%s7689_s13] sm:$0xff]  ;;  %v1225_v36 = vld [vmem:[%s6767_s17 + $0x78] sm:$0xff] }
  0x63   : > { %6064 = vmatprep.subr.mxu0 %v6741_v2  ;;  %6056 = vmatpush3.msra.mxu1 %v1212_v6  ;;  %v1093_v11 = vsel %vm1089_vm1, %v1092_v10, 0  ;;  %vm1104_vm5 = vcmp.eq.s32.totalorder %v1086_v5, 3  ;;  %v1102_v14 = vstv %s7003_s22  ;;  %vm1109_vm6 = vcmp.eq.s32.totalorder %v1086_v5, 4  ;;  %v1224_v39 = vld [vmem:[%s6767_s17 + $0x70] sm:$0xff]  ;;  %v1219_v40 = vld [vmem:[%s6767_s17 + $0x48] sm:$0xff]  ;;  %v1218_v42 = vld [vmem:[%s6767_s17 + $0x40] sm:$0xff] }
  0x64   : > { %6057 = vmatprep.subr.mxu1 %v6741_v2  ;;  %6061 = vmatprep.mubr.msk.f32.mxu1 %vm6742_vm0, %v6741_v2  ;;  %v1098_v13 = vsel %vm1094_vm2, %v1097_v12, %v1093_v11  ;;  %vm1114_vm7 = vcmp.eq.s32.totalorder %v1086_v5, 5  ;;  %v1112_v18 = vstv %s1111_s15  ;;  %vm1119_vm8 = vcmp.eq.s32.totalorder %v1086_v5, 6  ;;  %v1223_v41 = vld [vmem:[%s6767_s17 + $0x68] sm:$0xff]  ;;  %v1222_v43 = vld [vmem:[%s6767_s17 + $0x60] sm:$0xff]  ;;  %v1541_v44 = vld [vmem:[%s6777_s25 + $0x18] sm:$0xff]  ;;  %s7691_s2 = sld [smem:[#allocation14_spill]] }
  0x65   : > { %6058 = vmatpush3.msra.mxu1 %v1211_v8  ;;  %v1103_v15 = vsel %vm1099_vm4, %v1102_v14, %v1098_v13  ;;  %v1107_v16 = vstv %s7006_s26  ;;  %vm1124_vm9 = vcmp.eq.s32.totalorder %v1086_v5, 7  ;;  %v1545_v45 = vld [vmem:[%s6777_s25 + $0x38] sm:$0xff]  ;;  %v1540_v46 = vld [vmem:[%s6777_s25 + $0x10] sm:$0xff]  ;;  %v1539_v48 = vld [vmem:[%s6777_s25 + $0x8] sm:$0xff]  ;;  %s7690_s26 = sld [smem:[#allocation12_spill]]  ;;  %vm3278_vm14 = vcmask 523264  }
  0x66   : > { %6059 = vmatprep.subr.mxu1 %v6741_v2  ;;  %v1108_v17 = vsel %vm1104_vm5, %v1107_v16, %v1103_v15  ;;  %v1117_v20 = vstv %s1116_s1  ;;  %v1544_v47 = vld [vmem:[%s6777_s25 + $0x30] sm:$0xff]  ;;  %v1543_v49 = vld [vmem:[%s6777_s25 + $0x28] sm:$0xff]  ;;  %v1538_v50 = vld [vmem:[%s6777_s25] sm:$0xff]  ;;  %s7692_s5 = sld [smem:[#allocation15_spill]] }
  0x67   : > { %v1113_v19 = vsel %vm1109_vm6, %v1112_v18, %v1108_v17  ;;  %v1122_v22 = vstv %s1121_s9  ;;  %6060 = vmatpush3.msra.mxu1 %v1210_v30  ;;  %v1542_v51 = vld [vmem:[%s6777_s25 + $0x20] sm:$0xff]  ;;  %v1549_v52 = vld [vmem:[%s6777_s25 + $0x58] sm:$0xff]  ;;  %v1548_v54 = vld [vmem:[%s6777_s25 + $0x50] sm:$0xff]  ;;  %s7693_s30 = sld [smem:[#allocation18_spill]] }
  0x68   : > { %v1118_v21 = vsel %vm1114_vm7, %v1117_v20, %v1113_v19  ;;  %v1127_v24 = vstv %s1126_s18  ;;  %6075 = vmatprep.subr.mxu1 %v6741_v2  ;;  %v1553_v53 = vld [vmem:[%s6777_s25 + $0x78] sm:$0xff]  ;;  %v1552_v55 = vld [vmem:[%s6777_s25 + $0x70] sm:$0xff]  ;;  %v1547_v56 = vld [vmem:[%s6777_s25 + $0x48] sm:$0xff]  ;;  %s7694_s22 = sld [smem:[#allocation16_spill]] }
  0x69   : > { %v1123_v23 = vsel %vm1119_vm8, %v1122_v22, %v1118_v21  ;;  %v1551_v57 = vld [vmem:[%s6777_s25 + $0x68] sm:$0xff]  ;;  %v1546_v58 = vld [vmem:[%s6777_s25 + $0x40] sm:$0xff]  ;;  %v1865_v60 = vld [vmem:[%s7679_s3 + $0x18] sm:$0xff]  ;;  %s7695_s15 = sld [smem:[#allocation17_spill]] }
  0x6a   : > { %v1128_v25 = vsel %vm1124_vm9, %v1127_v24, %v1123_v23  ;;  %v1550_v59 = vld [vmem:[%s6777_s25 + $0x60] sm:$0xff]  ;;  %v1869_v61 = vld [vmem:[%s7679_s3 + $0x38] sm:$0xff]  ;;  %v1864_v62 = vld [vmem:[%s7679_s3 + $0x10] sm:$0xff]  ;;  %s7696_s1 = sld [smem:[#allocation20_spill]] }
  0x6b   : > { %vm1129_vm11 = vcmp.eq.s32.totalorder %v1088_v7, %v1128_v25  ;;  %v1868_v63 = vld [vmem:[%s7679_s3 + $0x30] sm:$0xff]  ;;  %v1863_v0 = vld [vmem:[%s7679_s3 + $0x8] sm:$0xff]  ;;  %v1862_v3 = vld [vmem:[%s7679_s3] sm:$0xff]  ;;  %s7697_s9 = sld [smem:[#allocation22_spill]] }
  0x6c   : > { %v5736_v27 = vsel %vm1129_vm11, 1.0, %v6741_v2  ;;  %v1867_v1 = vld [vmem:[%s7679_s3 + $0x28] sm:$0xff]  ;;  %v1866_v4 = vld [vmem:[%s7679_s3 + $0x20] sm:$0xff]  ;;  %v1873_v5 = vld [vmem:[%s7679_s3 + $0x58] sm:$0xff]  ;;  %s7698_s0 = sld [smem:[#allocation21_spill]] }
  0x6d   : > { %6051 = vmatmul.mubr.msk.f32.vlgmr.msra.gmra.mxu0 %vm1135_vm10, %v5736_v27  ;;  %v1877_v6 = vld [vmem:[%s7679_s3 + $0x78] sm:$0xff]  ;;  %v1872_v7 = vld [vmem:[%s7679_s3 + $0x50] sm:$0xff]  ;;  %v1871_v10 = vld [vmem:[%s7679_s3 + $0x48] sm:$0xff] }
  0x6e   : > { %6065 = vmatpush3.msra.mxu0 %v1217_v26  ;;  %6072 = vmatprep.mubr.msk.f32.mxu0 %vm6742_vm0, %v6741_v2  ;;  %v1876_v8 = vld [vmem:[%s7679_s3 + $0x70] sm:$0xff]  ;;  %v1875_v11 = vld [vmem:[%s7679_s3 + $0x68] sm:$0xff]  ;;  %v1870_v12 = vld [vmem:[%s7679_s3 + $0x40] sm:$0xff] }
  0x6f   : > { %6066 = vmatprep.subr.mxu0 %v6741_v2  ;;  %v1874_v13 = vld [vmem:[%s7679_s3 + $0x60] sm:$0xff]  ;;  %s7710_s3 = sld [smem:[#allocation31_spill]] }
  0x70   : > { %6067 = vmatpush3.msra.mxu0 %v1216_v28  ;;  %v5746_v22 = vld [vmem:[%s6782_s29] ss:$0 sm:$0xff]  ;;  %v5747_v23 = vld [vmem:[%s6782_s29 + $0x1] ss:$0 sm:$0xff] }
  0x71   : > { %6068 = vmatprep.subr.mxu0 %v6741_v2  ;;  %v5738_v26 = vld [vmem:[%s6772_s21] ss:$0 sm:$0xff]  ;;  %v5739_v27 = vld [vmem:[%s6772_s21 + $0x1] ss:$0 sm:$0xff] }
  0x72   : > { %6069 = vmatpush3.msra.mxu0 %v1215_v29  ;;  %s7699_s18 = smov %s7698_s0 }
  0x73   : > { %6070 = vmatprep.subr.mxu0 %v6741_v2 }
  0x74   : > { %6071 = vmatpush3.msra.mxu0 %v1214_v31 }
  0x75   : > { %6086 = vmatprep.subr.mxu0 %v6741_v2 }
 0x12d   : > { %v1205_v33 = vpop.f32.mrf.mxu0 }
 0x12e   : > { %v7043_v34 = vadd.f32 %v1205_v33, %v1134_v32 }
 0x12f   : > { %v6052_v37 = vpop.f32.mrf.mxu0 }
 0x130   : > { %6062 = vmatmul.mubr.msk.f32.vlgmr.msra.gmra.mxu1 %vm1254_vm12, %v7043_v34  ;;  %6073 = vmatmul.mubr.msk.f32.vlgmr.msra.gmra.mxu0 %vm1254_vm12, %v7043_v34 }
 0x131   : > { %6076 = vmatpush3.msra.mxu1 %v1221_v35  ;;  %6087 = vmatpush3.msra.mxu0 %v1225_v36  ;;  %v5749_v35 = vld [vmem:[%s6782_s29 + $0x3] ss:$0 sm:$0xff] }
 0x132   : > { %6077 = vmatprep.subr.mxu1 %v6741_v2  ;;  %6088 = vmatprep.subr.mxu0 %v6741_v2 }
 0x133   : > { %6078 = vmatpush3.msra.mxu1 %v1220_v38  ;;  %6089 = vmatpush3.msra.mxu0 %v1224_v39  ;;  %v5740_v38 = vld [vmem:[%s6772_s21 + $0x2] ss:$0 sm:$0xff]  ;;  %v5741_v39 = vld [vmem:[%s6772_s21 + $0x3] ss:$0 sm:$0xff] }
 0x134   : > { %6079 = vmatprep.subr.mxu1 %v6741_v2  ;;  %6090 = vmatprep.subr.mxu0 %v6741_v2 }
 0x135   : > { %6080 = vmatpush3.msra.mxu1 %v1219_v40  ;;  %6091 = vmatpush3.msra.mxu0 %v1223_v41 }
 0x136   : > { %6081 = vmatprep.subr.mxu1 %v6741_v2  ;;  %6092 = vmatprep.subr.mxu0 %v6741_v2 }
 0x137   : > { %6082 = vmatpush3.msra.mxu1 %v1218_v42  ;;  %6083 = vmatprep.mubr.msk.f32.mxu1 %vm6742_vm0, %v6741_v2 }
 0x138   : > { %6093 = vmatpush3.msra.mxu0 %v1222_v43  ;;  %6094 = vmatprep.mubr.msk.f32.mxu0 %vm6742_vm0, %v6741_v2 }
 0x139   : > { %6084 = vmatmul.mubr.msk.f32.vlgmr.msra.gmra.mxu1 %vm1254_vm12, %v7043_v34  ;;  %6095 = vmatmul.mubr.msk.f32.vlgmr.msra.gmra.mxu0 %vm1254_vm12, %v7043_v34 }
 0x13a   : > { %6097 = vmatprep.subr.mxu1 %v6741_v2  ;;  %6108 = vmatprep.subr.mxu0 %v6741_v2 }
 0x13b   : > { %6098 = vmatpush3.msra.mxu1 %v1541_v44  ;;  %6109 = vmatpush3.msra.mxu0 %v1545_v45 }
 0x13c   : > { %6099 = vmatprep.subr.mxu1 %v6741_v2  ;;  %6110 = vmatprep.subr.mxu0 %v6741_v2 }
 0x13d   : > { %6100 = vmatpush3.msra.mxu1 %v1540_v46  ;;  %6111 = vmatpush3.msra.mxu0 %v1544_v47  ;;  %v5754_v46 = vld [vmem:[%s7677_s8] ss:$0 sm:$0xff]  ;;  %v5755_v47 = vld [vmem:[%s7677_s8 + $0x1] ss:$0 sm:$0xff] }
 0x13e   : > { %6101 = vmatprep.subr.mxu1 %v6741_v2  ;;  %6112 = vmatprep.subr.mxu0 %v6741_v2 }
 0x13f   : > { %6102 = vmatpush3.msra.mxu1 %v1539_v48  ;;  %6113 = vmatpush3.msra.mxu0 %v1543_v49 }
 0x140   : > { %6103 = vmatprep.subr.mxu1 %v6741_v2  ;;  %6114 = vmatprep.subr.mxu0 %v6741_v2 }
 0x141   : > { %6104 = vmatpush3.msra.mxu1 %v1538_v50  ;;  %6105 = vmatprep.mubr.msk.f32.mxu1 %vm6742_vm0, %v6741_v2 }
 0x142   : > { %6115 = vmatpush3.msra.mxu0 %v1542_v51  ;;  %6116 = vmatprep.mubr.msk.f32.mxu0 %vm6742_vm0, %v6741_v2 }
 0x143   : > { %6106 = vmatmul.mubr.msk.f32.vlgmr.msra.gmra.mxu1 %vm1254_vm12, %v7043_v34  ;;  %6117 = vmatmul.mubr.msk.f32.vlgmr.msra.gmra.mxu0 %vm1254_vm12, %v7043_v34 }
 0x144   : > { %6119 = vmatprep.subr.mxu1 %v6741_v2  ;;  %6130 = vmatprep.subr.mxu0 %v6741_v2 }
 0x145   : > { %6120 = vmatpush3.msra.mxu1 %v1549_v52  ;;  %6131 = vmatpush3.msra.mxu0 %v1553_v53 }
 0x146   : > { %6121 = vmatprep.subr.mxu1 %v6741_v2  ;;  %6132 = vmatprep.subr.mxu0 %v6741_v2 }
 0x147   : > { %6122 = vmatpush3.msra.mxu1 %v1548_v54  ;;  %6133 = vmatpush3.msra.mxu0 %v1552_v55 }
 0x148   : > { %6123 = vmatprep.subr.mxu1 %v6741_v2  ;;  %6134 = vmatprep.subr.mxu0 %v6741_v2 }
 0x149   : > { %6124 = vmatpush3.msra.mxu1 %v1547_v56  ;;  %6135 = vmatpush3.msra.mxu0 %v1551_v57 }
 0x14a   : > { %6125 = vmatprep.subr.mxu1 %v6741_v2  ;;  %6136 = vmatprep.subr.mxu0 %v6741_v2 }
 0x14b   : > { %6126 = vmatpush3.msra.mxu1 %v1546_v58  ;;  %6127 = vmatprep.mubr.msk.f32.mxu1 %vm6742_vm0, %v6741_v2 }
 0x14c   : > { %6137 = vmatpush3.msra.mxu0 %v1550_v59  ;;  %6138 = vmatprep.mubr.msk.f32.mxu0 %vm6742_vm0, %v6741_v2 }
 0x14d   : > { %6128 = vmatmul.mubr.msk.f32.vlgmr.msra.gmra.mxu1 %vm1254_vm12, %v7043_v34  ;;  %6139 = vmatmul.mubr.msk.f32.vlgmr.msra.gmra.mxu0 %vm1254_vm12, %v7043_v34 }
 0x14e   : > { %6141 = vmatprep.subr.mxu1 %v6741_v2  ;;  %6152 = vmatprep.subr.mxu0 %v6741_v2 }
 0x14f   : > { %6142 = vmatpush3.msra.mxu1 %v1865_v60  ;;  %6153 = vmatpush3.msra.mxu0 %v1869_v61 }
 0x150   : > { %6143 = vmatprep.subr.mxu1 %v6741_v2  ;;  %6154 = vmatprep.subr.mxu0 %v6741_v2 }
 0x151   : > { %6144 = vmatpush3.msra.mxu1 %v1864_v62  ;;  %6155 = vmatpush3.msra.mxu0 %v1868_v63 }
 0x152   : > { %6145 = vmatprep.subr.mxu1 %v6741_v2  ;;  %6156 = vmatprep.subr.mxu0 %v6741_v2 }
 0x153   : > { %6146 = vmatpush3.msra.mxu1 %v1863_v0  ;;  %6157 = vmatpush3.msra.mxu0 %v1867_v1 }
 0x154   : > { %6147 = vmatprep.subr.mxu1 %v6741_v2  ;;  %6158 = vmatprep.subr.mxu0 %v6741_v2 }
 0x155   : > { %6148 = vmatpush3.msra.mxu1 %v1862_v3  ;;  %6149 = vmatprep.mubr.msk.f32.mxu1 %vm6742_vm0, %v6741_v2 }
 0x156   : > { %6159 = vmatpush3.msra.mxu0 %v1866_v4  ;;  %6160 = vmatprep.mubr.msk.f32.mxu0 %vm6742_vm0, %v6741_v2 }
 0x157   : > { %6150 = vmatmul.mubr.msk.f32.vlgmr.msra.gmra.mxu1 %vm1254_vm12, %v7043_v34  ;;  %6161 = vmatmul.mubr.msk.f32.vlgmr.msra.gmra.mxu0 %vm1254_vm12, %v7043_v34 }
 0x158   : > { %6163 = vmatprep.subr.mxu1 %v6741_v2  ;;  %6174 = vmatprep.subr.mxu0 %v6741_v2 }
 0x159   : > { %6164 = vmatpush3.msra.mxu1 %v1873_v5  ;;  %6175 = vmatpush3.msra.mxu0 %v1877_v6 }
 0x15a   : > { %6165 = vmatprep.subr.mxu1 %v6741_v2  ;;  %6176 = vmatprep.subr.mxu0 %v6741_v2 }
 0x15b   : > { %6166 = vmatpush3.msra.mxu1 %v1872_v7  ;;  %6177 = vmatpush3.msra.mxu0 %v1876_v8 }
 0x15c   : > { %6167 = vmatprep.subr.mxu1 %v6741_v2  ;;  %6178 = vmatprep.subr.mxu0 %v6741_v2 }
 0x15d   : > { %6168 = vmatpush3.msra.mxu1 %v1871_v10  ;;  %6179 = vmatpush3.msra.mxu0 %v1875_v11 }
 0x15e   : > { %6169 = vmatprep.subr.mxu1 %v6741_v2  ;;  %6180 = vmatprep.subr.mxu0 %v6741_v2 }
 0x15f   : > { %6170 = vmatpush3.msra.mxu1 %v1870_v12  ;;  %6171 = vmatprep.mubr.msk.f32.mxu1 %vm6742_vm0, %v6741_v2 }
 0x160   : > { %6181 = vmatpush3.msra.mxu0 %v1874_v13  ;;  %6182 = vmatprep.mubr.msk.f32.mxu0 %vm6742_vm0, %v6741_v2 }
 0x161   : > { %6172 = vmatmul.mubr.msk.f32.vlgmr.msra.gmra.mxu1 %vm1254_vm12, %v7043_v34  ;;  %6183 = vmatmul.mubr.msk.f32.vlgmr.msra.gmra.mxu0 %vm1254_vm12, %v7043_v34  ;;  %v5748_v34 = vld [vmem:[%s6782_s29 + $0x2] ss:$0 sm:$0xff] }
 0x162   : > { %6185 = vmatprep.subr.mxu1 %v6741_v2  ;;  %6190 = vmatprep.subr.mxu0 %v6741_v2 }
 0x163   : > { %6187 = vmatprep.mubr.msk.f32.mxu1 %vm6742_vm0, %v6741_v2  ;;  %6192 = vmatprep.mubr.msk.f32.mxu0 %vm6742_vm0, %v6741_v2 }
 0x1f0   : > { %v1324_v14 = vpop.f32.mrf.mxu1  ;;  %v1394_v15 = vpop.f32.mrf.mxu0 }
 0x1f1   : > { %v1325_v32 = vadd.f32 %v5738_v26, %v1324_v14  ;;  %v1395_v33 = vadd.f32 %v5739_v27, %v1394_v15 }
 0x1f2   : > { %v6063_v16 = vpop.f32.mrf.mxu1  ;;  %v6074_v17 = vpop.f32.mrf.mxu0 }
 0x1f9   : > { %v1464_v18 = vpop.f32.mrf.mxu1  ;;  %v1534_v19 = vpop.f32.mrf.mxu0 }
 0x1fa   : > { %v1465_v44 = vadd.f32 %v5740_v38, %v1464_v18  ;;  %v1535_v45 = vadd.f32 %v5741_v39, %v1534_v19  ;;  %v5756_v39 = vld [vmem:[%s7677_s8 + $0x2] ss:$0 sm:$0xff] }
 0x1fb   : > { %v6085_v20 = vpop.f32.mrf.mxu1  ;;  %v6096_v21 = vpop.f32.mrf.mxu0 }
 0x203   : > { %v1648_v24 = vpop.f32.mrf.mxu1  ;;  %v1718_v25 = vpop.f32.mrf.mxu0 }
 0x204   : > { %v1649_v28 = vadd.f32 %v5746_v22, %v1648_v24  ;;  %v1719_v29 = vadd.f32 %v5747_v23, %v1718_v25 }
 0x205   : > { %v6107_v30 = vpop.f32.mrf.mxu1  ;;  %v6118_v31 = vpop.f32.mrf.mxu0 }
 0x206   : > { %6186 = vmatpush3.xpose.msk.msra.mxu1 %vm2186_vm13, %v1649_v28  ;;  %6191 = vmatpush3.xpose.msk.msra.mxu0 %vm2186_vm13, %v1719_v29 }
 0x207   : > { %6195 = vmatprep.subr.mxu1 %v6741_v2  ;;  %6200 = vmatprep.subr.mxu0 %v6741_v2 }
 0x209   : > { %6188 = vmatmul.mubr.msk.f32.vlgmr.msra.gmra.mxu1 %vm2186_vm13, %v1325_v32  ;;  %6193 = vmatmul.mubr.msk.f32.vlgmr.msra.gmra.mxu0 %vm2186_vm13, %v1395_v33 }
 0x20a   : > { %6197 = vmatprep.mubr.msk.f32.mxu1 %vm6742_vm0, %v6741_v2  ;;  %6202 = vmatprep.mubr.msk.f32.mxu0 %vm6742_vm0, %v6741_v2 }
 0x20d   : > { %v1788_v36 = vpop.f32.mrf.mxu1  ;;  %v1858_v37 = vpop.f32.mrf.mxu0 }
 0x20e   : > { %v1789_v40 = vadd.f32 %v5748_v34, %v1788_v36  ;;  %v1859_v41 = vadd.f32 %v5749_v35, %v1858_v37 }
 0x20f   : > { %v6129_v42 = vpop.f32.mrf.mxu1  ;;  %v6140_v43 = vpop.f32.mrf.mxu0 }
 0x210   : > { %6196 = vmatpush3.xpose.msk.msra.mxu1 %vm2186_vm13, %v1789_v40  ;;  %6201 = vmatpush3.xpose.msk.msra.mxu0 %vm2186_vm13, %v1859_v41 }
 0x211   : > { %6205 = vmatprep.subr.mxu1 %v6741_v2  ;;  %6210 = vmatprep.subr.mxu0 %v6741_v2 }
 0x213   : > { %6198 = vmatmul.mubr.msk.f32.vlgmr.msra.gmra.mxu1 %vm2186_vm13, %v1465_v44  ;;  %6203 = vmatmul.mubr.msk.f32.vlgmr.msra.gmra.mxu0 %vm2186_vm13, %v1535_v45  ;;  %v5757_v44 = vld [vmem:[%s7677_s8 + $0x3] ss:$0 sm:$0xff]  ;;  %s6743_s8 = smov [#allocation4]  }
 0x214   : > { %6207 = vmatprep.mubr.msk.f32.mxu1 %vm6742_vm0, %v6741_v2  ;;  %6212 = vmatprep.mubr.msk.f32.mxu0 %vm6742_vm0, %v6741_v2 }
 0x217   : > { %v1972_v48 = vpop.f32.mrf.mxu1  ;;  %v2042_v49 = vpop.f32.mrf.mxu0 }
 0x218   : > { %v1973_v50 = vadd.f32 %v5754_v46, %v1972_v48  ;;  %v2043_v51 = vadd.f32 %v5755_v47, %v2042_v49 }
 0x219   : > { %v6151_v52 = vpop.f32.mrf.mxu1  ;;  %v6162_v53 = vpop.f32.mrf.mxu0 }
 0x21a   : > { %6206 = vmatpush3.msra.mxu1 %v1973_v50  ;;  %6211 = vmatpush3.msra.mxu0 %v2043_v51  ;;  %v2837_v52 = vld [vmem:[%s6797_s14] sm:$0xff]  ;;  %v2838_v53 = vld [vmem:[%s6797_s14 + $0x8] sm:$0xff] }
 0x21b   : > { %6215 = vmatprep.subr.mxu1 %v6741_v2  ;;  %6220 = vmatprep.subr.mxu0 %v6741_v2 }
 0x221   : > { %v7205_v54 = vpop.f32.mrf.mxu1  ;;  %v7207_v55 = vpop.f32.mrf.mxu0 }
 0x222   : > { %v2113_v43 = vadd.f32 %v5756_v39, %v7205_v54  ;;  %v2183_v47 = vadd.f32 %v5757_v44, %v7207_v55  ;;  %v2839_v54 = vld [vmem:[%s6797_s14 + $0x10] sm:$0xff]  ;;  %v3264_v44 = vld [vmem:[%s6827_s20 + $0x8] sm:$0xff] }
 0x223   : > { %v6173_v56 = vpop.f32.mrf.mxu1  ;;  %v6184_v57 = vpop.f32.mrf.mxu0 }
 0x224   : > { %v2840_v57 = vld [vmem:[%s6797_s14 + $0x18] sm:$0xff] }
 0x2c9   : > { %v2259_v58 = vpop.f32.mrf.mxu1  ;;  %v2335_v59 = vpop.f32.mrf.mxu0 }
 0x2ca   : > { %v2491_v60 = vmul.f32 0.35355338, %v2259_v58  ;;  %v2492_v61 = vmul.f32 0.35355338, %v2335_v59 }
 0x2cb   : > { %v6189_v62 = vpop.f32.mrf.mxu1  ;;  %v6194_v63 = vpop.f32.mrf.mxu0 }
 0x2cc   : > { %v2497_v0 = vsel %vm7014_vm3, %v2491_v60, -1e+30  ;;  %v2498_v3 = vsel %vm7014_vm3, %v2492_v61, -1e+30 }
 0x2cd   : > { %v2501_v1 = vsel %vm2186_vm13, %v2497_v0, -inf  ;;  %v2504_v4 = vsel %vm2186_vm13, %v2498_v3, -inf }
 0x2ce   : > { %2502 = vmax.xlane.f32.xlu0 %v2501_v1 }
 0x2d2   : > { %2505 = vmax.xlane.f32.xlu0 %v2504_v4 }
 0x2d3   : > { %v2411_v5 = vpop.f32.mrf.mxu1  ;;  %v2487_v6 = vpop.f32.mrf.mxu0 }
 0x2d4   : > { %v2493_v7 = vmul.f32 0.35355338, %v2411_v5  ;;  %v2494_v8 = vmul.f32 0.35355338, %v2487_v6 }
 0x2d5   : > { %v6199_v10 = vpop.f32.mrf.mxu1  ;;  %v6204_v11 = vpop.f32.mrf.mxu0 }
 0x2d6   : > { %v2499_v12 = vsel %vm7014_vm3, %v2493_v7, -1e+30  ;;  %v2500_v14 = vsel %vm7014_vm3, %v2494_v8, -1e+30 }
 0x2d7   : > { %v2507_v13 = vsel %vm2186_vm13, %v2499_v12, -inf  ;;  %v2510_v15 = vsel %vm2186_vm13, %v2500_v14, -inf }
 0x2d8   : > { %2508 = vmax.xlane.f32.xlu1 %v2507_v13 }
 0x2dc   : > { %2511 = vmax.xlane.f32.xlu1 %v2510_v15  ;;  %v5778_v15 = vld [vmem:[%s6802_s19] ss:$0 sm:$0xff] }
 0x357   : > { %v2503_v16 = vpop.xlane.xlu0 %2502 }
 0x358   : > { %v2513_v17 = vsub.f32 %v2497_v0, %v2503_v16 }
 0x35a   : > { %v2517_v18 = vmul.f32 1.442695, %v2513_v17 }
 0x35b   : > { %v2506_v19 = vpop.xlane.xlu0 %2505 }
 0x35c   : > { %6587 = vpow2.f32 %v2517_v18  ;;  %v2514_v20 = vsub.f32 %v2498_v3, %v2506_v19 }
 0x35e   : > { %v2519_v21 = vmul.f32 1.442695, %v2514_v20 }
 0x360   : > { %6589 = vpow2.f32 %v2519_v21 }
 0x361   : > { %v2509_v22 = vpop.xlane.xlu1 %2508 }
 0x362   : > { %v2515_v23 = vsub.f32 %v2499_v12, %v2509_v22 }
 0x364   : > { %v2521_v24 = vmul.f32 1.442695, %v2515_v23 }
 0x365   : > { %v2512_v25 = vpop.xlane.xlu1 %2511 }
 0x366   : > { %6591 = vpow2.f32 %v2521_v24  ;;  %v2516_v26 = vsub.f32 %v2500_v14, %v2512_v25  ;;  %v3181_v25 = vld [vmem:[%s7678_s6 + $0x18] sm:$0xff] }
 0x368   : > { %v2523_v27 = vmul.f32 1.442695, %v2516_v26  ;;  %v3180_v26 = vld [vmem:[%s7678_s6 + $0x10] sm:$0xff] }
 0x369   : > { %v6588_v28 = vpop.eup %6587 }
 0x36a   : > { %6593 = vpow2.f32 %v2523_v27  ;;  %v2525_v29 = vsel %vm2186_vm13, %v6588_v28, 0.0  ;;  %v3179_v27 = vld [vmem:[%s7678_s6 + $0x8] sm:$0xff] }
 0x36b   : > { %2526 = vadd.xlane.f32.xlu0 %v2525_v29  ;;  %v3270_v29 = vld [vmem:[%s6827_s20 + $0x38] sm:$0xff] }
 0x36d   : > { %v6590_v30 = vpop.eup %6589 }
 0x36e   : > { %v2528_v31 = vsel %vm2186_vm13, %v6590_v30, 0.0 }
 0x36f   : > { %2529 = vadd.xlane.f32.xlu1 %v2528_v31  ;;  %v3268_v31 = vld [vmem:[%s6827_s20 + $0x28] sm:$0xff] }
 0x373   : > { %v6592_v32 = vpop.eup %6591 }
 0x374   : > { %v2531_v33 = vsel %vm2186_vm13, %v6592_v32, 0.0 }
 0x375   : > { %2532 = vadd.xlane.f32.xlu0 %v2531_v33  ;;  %v3266_v33 = vld [vmem:[%s6827_s20 + $0x18] sm:$0xff] }
 0x377   : > { %v6594_v34 = vpop.eup %6593 }
 0x378   : > { %v2534_v35 = vsel %vm2186_vm13, %v6594_v34, 0.0 }
 0x379   : > { %2535 = vadd.xlane.f32.xlu1 %v2534_v35 }
 0x3f4   : > { %v2527_v36 = vpop.xlane.xlu0 %2526 }
 0x3f5   : > { %6595 = vrcp.f32 %v2527_v36 }
 0x3f8   : > { %v2530_v37 = vpop.xlane.xlu1 %2529 }
 0x3f9   : > { %6597 = vrcp.f32 %v2530_v37 }
 0x3fe   : > { %v2533_v38 = vpop.xlane.xlu0 %2532 }
 0x3ff   : > { %6599 = vrcp.f32 %v2533_v38  ;;  %v5779_v38 = vld [vmem:[%s6807_s24] ss:$0 sm:$0xff] }
 0x402   : > { %v6596_v40 = vpop.eup %6595  ;;  %v2536_v41 = vpop.xlane.xlu1 %2535 }
 0x403   : > { %6601 = vrcp.f32 %v2536_v41  ;;  %v2541_v42 = vmul.f32 %v6596_v40, %v6588_v28  ;;  %v3178_v28 = vld [vmem:[%s7678_s6] sm:$0xff] }
 0x404   : > { %v5780_v40 = vld [vmem:[%s7690_s26] ss:$0 sm:$0xff]  ;;  %s7700_s26 = sld [smem:[#allocation19_spill]] }
 0x405   : > { %6208 = vmatmul.mubr.msk.f32.vlgmr.msra.gmra.mxu1 %vm2186_vm13, %v2541_v42 }
 0x406   : > { %v6598_v45 = vpop.eup %6597  ;;  %6216 = vmatpush3.msra.mxu1 %v2113_v43  ;;  %6217 = vmatprep.mubr.msk.f32.mxu1 %vm6742_vm0, %v6741_v2  ;;  %v3265_v43 = vld [vmem:[%s6827_s20 + $0x10] sm:$0xff] }
 0x407   : > { %v2542_v46 = vmul.f32 %v6598_v45, %v6590_v30  ;;  %6225 = vmatprep.subr.mxu1 %v6741_v2  ;;  %v3269_v30 = vld [vmem:[%s6827_s20 + $0x30] sm:$0xff]  ;;  %v3263_v45 = vld [vmem:[%s6827_s20] sm:$0xff] }
 0x409   : > { %6213 = vmatmul.mubr.msk.f32.vlgmr.msra.gmra.mxu0 %vm2186_vm13, %v2542_v46  ;;  %v5781_v46 = vld [vmem:[%s7691_s2] ss:$0 sm:$0xff]  ;;  %s7701_s2 = sld [smem:[#allocation23_spill]] }
 0x40a   : > { %6221 = vmatpush3.msra.mxu0 %v2183_v47  ;;  %6222 = vmatprep.mubr.msk.f32.mxu0 %vm6742_vm0, %v6741_v2 }
 0x40b   : > { %6230 = vmatprep.subr.mxu0 %v6741_v2 }
 0x40c   : > { %v6600_v48 = vpop.eup %6599 }
 0x40d   : > { %v2543_v49 = vmul.f32 %v6600_v48, %v6592_v32  ;;  %v3267_v32 = vld [vmem:[%s6827_s20 + $0x20] sm:$0xff] }
 0x40f   : > { %6218 = vmatmul.mubr.msk.f32.vlgmr.msra.gmra.mxu1 %vm2186_vm13, %v2543_v49 }
 0x410   : > { %v6602_v50 = vpop.eup %6601  ;;  %6227 = vmatprep.mubr.msk.f32.mxu1 %vm6742_vm0, %v6741_v2  ;;  %6226 = vmatpush3.msra.mxu1 %v2837_v52 }
 0x411   : > { %v2544_v51 = vmul.f32 %v6602_v50, %v6594_v34  ;;  %6235 = vmatprep.subr.mxu1 %v6741_v2 }
 0x413   : > { %6223 = vmatmul.mubr.msk.f32.vlgmr.msra.gmra.mxu0 %vm2186_vm13, %v2544_v51  ;;  %v5783_v51 = vld [vmem:[%s7692_s5] ss:$0 sm:$0xff]  ;;  %s7702_s5 = sld [smem:[#allocation24_spill]] }
 0x414   : > { %6232 = vmatprep.mubr.msk.f32.mxu0 %vm6742_vm0, %v6741_v2  ;;  %6231 = vmatpush3.msra.mxu0 %v2838_v53 }
 0x415   : > { %6240 = vmatprep.subr.mxu0 %v6741_v2 }
 0x4c5   : > { %v2614_v55 = vpop.f32.mrf.mxu1 }
 0x4c6   : > { %6228 = vmatmul.mubr.msk.f32.vlgmr.msra.gmra.mxu1 %vm2186_vm13, %v2614_v55 }
 0x4c7   : > { %v6209_v56 = vpop.f32.mrf.mxu1  ;;  %6236 = vmatpush3.msra.mxu1 %v2839_v54  ;;  %6237 = vmatprep.mubr.msk.f32.mxu1 %vm6742_vm0, %v6741_v2 }
 0x4c8   : > { %6245 = vmatprep.subr.mxu1 %v6741_v2 }
 0x4c9   : > { %v2687_v58 = vpop.f32.mrf.mxu0 }
 0x4ca   : > { %6233 = vmatmul.mubr.msk.f32.vlgmr.msra.gmra.mxu0 %vm2186_vm13, %v2687_v58 }
 0x4cb   : > { %v6214_v59 = vpop.f32.mrf.mxu0  ;;  %6241 = vmatpush3.msra.mxu0 %v2840_v57  ;;  %6242 = vmatprep.mubr.msk.f32.mxu0 %vm6742_vm0, %v6741_v2 }
 0x4cc   : > { %6256 = vmatprep.subr.mxu0 %v6741_v2 }
 0x4cf   : > { %v2760_v60 = vpop.f32.mrf.mxu1 }
 0x4d0   : > { %6238 = vmatmul.mubr.msk.f32.vlgmr.msra.gmra.mxu1 %vm2186_vm13, %v2760_v60 }
 0x4d1   : > { %v6219_v61 = vpop.f32.mrf.mxu1  ;;  %6253 = vmatprep.mubr.msk.f32.mxu1 %vm6742_vm0, %v6741_v2  ;;  %6246 = vmatpush3.msra.mxu1 %v3181_v25  ;;  %v3397_v25 = vld [vmem:[%s7693_s30 + $0x78] sm:$0xff] }
 0x4d2   : > { %6247 = vmatprep.subr.mxu1 %v6741_v2 }
 0x4d3   : > { %v2833_v62 = vpop.f32.mrf.mxu0  ;;  %6248 = vmatpush3.msra.mxu1 %v3180_v26  ;;  %v3720_v26 = vld [vmem:[%s7696_s1 + $0x58] sm:$0xff] }
 0x4d4   : > { %6243 = vmatmul.mubr.msk.f32.vlgmr.msra.gmra.mxu0 %vm2186_vm13, %v2833_v62  ;;  %6249 = vmatprep.subr.mxu1 %v6741_v2  ;;  %v3385_v62 = vld [vmem:[%s7693_s30 + $0x18] sm:$0xff] }
 0x4d5   : > { %v6224_v63 = vpop.f32.mrf.mxu0  ;;  %6272 = vmatprep.mubr.msk.f32.mxu0 %vm6742_vm0, %v6741_v2  ;;  %6250 = vmatpush3.msra.mxu1 %v3179_v27  ;;  %v3396_v27 = vld [vmem:[%s7693_s30 + $0x70] sm:$0xff] }
 0x4d6   : > { %6251 = vmatprep.subr.mxu1 %v6741_v2  ;;  %6257 = vmatpush3.msra.mxu0 %v3270_v29  ;;  %v3393_v63 = vld [vmem:[%s7693_s30 + $0x58] sm:$0xff]  ;;  %v3395_v29 = vld [vmem:[%s7693_s30 + $0x68] sm:$0xff] }
 0x4d7   : > { %6252 = vmatpush3.msra.mxu1 %v3178_v28  ;;  %6258 = vmatprep.subr.mxu0 %v6741_v2  ;;  %v3719_v28 = vld [vmem:[%s7696_s1 + $0x50] sm:$0xff] }
 0x4d8   : > { %6275 = vmatprep.subr.mxu1 %v6741_v2  ;;  %6259 = vmatpush3.msra.mxu0 %v3269_v30  ;;  %v3718_v30 = vld [vmem:[%s7696_s1 + $0x48] sm:$0xff] }
 0x4d9   : > { %6260 = vmatprep.subr.mxu0 %v6741_v2 }
 0x4da   : > { %6261 = vmatpush3.msra.mxu0 %v3268_v31  ;;  %v3394_v31 = vld [vmem:[%s7693_s30 + $0x60] sm:$0xff] }
 0x4db   : > { %6262 = vmatprep.subr.mxu0 %v6741_v2 }
 0x4dc   : > { %6263 = vmatpush3.msra.mxu0 %v3267_v32  ;;  %v3717_v32 = vld [vmem:[%s7696_s1 + $0x40] sm:$0xff] }
 0x4dd   : > { %6264 = vmatprep.subr.mxu0 %v6741_v2 }
 0x4de   : > { %6265 = vmatpush3.msra.mxu0 %v3266_v33  ;;  %v3716_v33 = vld [vmem:[%s7696_s1 + $0x38] sm:$0xff] }
 0x4df   : > { %6266 = vmatprep.subr.mxu0 %v6741_v2 }
 0x4e0   : > { %6267 = vmatpush3.msra.mxu0 %v3265_v43  ;;  %v3723_v43 = vld [vmem:[%s7696_s1 + $0x70] sm:$0xff] }
 0x4e1   : > { %6268 = vmatprep.subr.mxu0 %v6741_v2 }
 0x4e2   : > { %6269 = vmatpush3.msra.mxu0 %v3264_v44  ;;  %v4043_v44 = vld [vmem:[%s7697_s9 + $0x50] sm:$0xff] }
 0x4e3   : > { %6270 = vmatprep.subr.mxu0 %v6741_v2 }
 0x4e4   : > { %6271 = vmatpush3.msra.mxu0 %v3263_v45  ;;  %v3722_v45 = vld [vmem:[%s7696_s1 + $0x68] sm:$0xff] }
 0x4e5   : > { %6297 = vmatprep.subr.mxu0 %v6741_v2 }
 0x586   : > { %v2910_v0 = vpop.f32.mrf.mxu1 }
 0x587   : > { %v3133_v7 = vsel %vm1254_vm12, %v2910_v0, 0.0  ;;  %v3384_v0 = vld [vmem:[%s7693_s30 + $0x10] sm:$0xff] }
 0x588   : > { %v6229_v1 = vpop.f32.mrf.mxu1 }
 0x589   : > { %v3392_v1 = vld [vmem:[%s7693_s30 + $0x50] sm:$0xff] }
 0x58a   : > { %v2983_v3 = vpop.f32.mrf.mxu0 }
 0x58b   : > { %v3134_v5 = vsel %vm1254_vm12, %v2983_v3, 0.0  ;;  %v3383_v3 = vld [vmem:[%s7693_s30 + $0x8] sm:$0xff] }
 0x58c   : > { %v6234_v4 = vpop.f32.mrf.mxu0  ;;  %v3135_v10 = vadd.f32 %v3134_v5, %v3133_v7  ;;  %v3382_v5 = vld [vmem:[%s7693_s30] sm:$0xff] }
 0x58d   : > { %v3391_v4 = vld [vmem:[%s7693_s30 + $0x48] sm:$0xff] }
 0x590   : > { %v3056_v6 = vpop.f32.mrf.mxu1 }
 0x591   : > { %v3136_v8 = vsel %vm1254_vm12, %v3056_v6, 0.0  ;;  %v3390_v6 = vld [vmem:[%s7693_s30 + $0x40] sm:$0xff] }
 0x592   : > { %v6239_v11 = vpop.f32.mrf.mxu1  ;;  %v3137_v12 = vadd.f32 %v3136_v8, %v3135_v10 }
 0x594   : > { %v3129_v13 = vpop.f32.mrf.mxu0 }
 0x595   : > { %v3138_v14 = vsel %vm1254_vm12, %v3129_v13, 0.0 }
 0x596   : > { %v3139_v16 = vadd.f32 %v3138_v14, %v3137_v12  ;;  %v6244_v17 = vpop.f32.mrf.mxu0  ;;  %v5785_v12 = vld [vmem:[%s7694_s22] ss:$0 sm:$0xff]  ;;  %s7703_s22 = sld [smem:[#allocation25_spill]] }
 0x597   : > { %v5786_v14 = vld [vmem:[%s7695_s15] ss:$0 sm:$0xff]  ;;  %v3389_v17 = vld [vmem:[%s7693_s30 + $0x38] sm:$0xff]  ;;  %s7704_s15 = sld [smem:[#allocation28_spill]] }
 0x598   : > { %v3147_v18 = vadd.f32 %v5778_v15, %v3139_v16 }
 0x59a   : > { %v3150_v19 = vsel %vm1254_vm12, %v3147_v18, 0.0 }
 0x59b   : > { %3151 = vadd.xlane.f32.xlu0 %v3150_v19  ;;  %v3388_v19 = vld [vmem:[%s7693_s30 + $0x30] sm:$0xff] }
 0x624   : > { %v3152_v20 = vpop.xlane.xlu0 %3151 }
 0x625   : > { %v3154_v21 = vmul.f32 0.03125, %v3152_v20  ;;  %v3711_v20 = vld [vmem:[%s7696_s1 + $0x10] sm:$0xff] }
 0x627   : > { %v3155_v22 = vsub.f32 %v3147_v18, %v3154_v21  ;;  %v3712_v18 = vld [vmem:[%s7696_s1 + $0x18] sm:$0xff]  ;;  %v3387_v21 = vld [vmem:[%s7693_s30 + $0x28] sm:$0xff] }
 0x629   : > { %v3156_v23 = vmul.f32 %v3155_v22, %v3155_v22 }
 0x62b   : > { %v3157_v24 = vsel %vm1254_vm12, %v3156_v23, 0.0  ;;  %v3386_v23 = vld [vmem:[%s7693_s30 + $0x20] sm:$0xff] }
 0x62c   : > { %3158 = vadd.xlane.f32.xlu1 %v3157_v24  ;;  %v3709_v24 = vld [vmem:[%s7696_s1] sm:$0xff] }
 0x6b5   : > { %v3159_v34 = vpop.xlane.xlu1 %3158 }
 0x6b6   : > { %v3160_v35 = vmul.f32 0.03125, %v3159_v34  ;;  %v4036_v34 = vld [vmem:[%s7697_s9 + $0x18] sm:$0xff] }
 0x6b8   : > { %v3161_v36 = vadd.f32 1e-05, %v3160_v35  ;;  %v3715_v35 = vld [vmem:[%s7696_s1 + $0x30] sm:$0xff] }
 0x6ba   : > { %6603 = vrsqrt.f32 %v3161_v36  ;;  %v4035_v36 = vld [vmem:[%s7697_s9 + $0x10] sm:$0xff] }
 0x6c7   : > { %v6604_v37 = vpop.eup %6603 }
 0x6c8   : > { %v3163_v39 = vmul.f32 %v6604_v37, %v3155_v22  ;;  %v3710_v22 = vld [vmem:[%s7696_s1 + $0x8] sm:$0xff] }
 0x6c9   : > { %v3714_v37 = vld [vmem:[%s7696_s1 + $0x28] sm:$0xff] }
 0x6ca   : > { %v3170_v41 = vmul.f32 %v5779_v38, %v3163_v39  ;;  %v4034_v38 = vld [vmem:[%s7697_s9 + $0x8] sm:$0xff]  ;;  %v3713_v39 = vld [vmem:[%s7696_s1 + $0x20] sm:$0xff] }
 0x6cc   : > { %v3177_v42 = vadd.f32 %v5780_v40, %v3170_v41  ;;  %v4033_v40 = vld [vmem:[%s7697_s9] sm:$0xff]  ;;  %v3724_v41 = vld [vmem:[%s7696_s1 + $0x78] sm:$0xff] }
 0x6ce   : > { %6254 = vmatmul.mubr.msk.f32.vlgmr.msra.gmra.mxu1 %vm1254_vm12, %v3177_v42 }
 0x6cf   : > { %6283 = vmatprep.mubr.msk.f32.mxu1 %vm6742_vm0, %v6741_v2  ;;  %6276 = vmatpush3.msra.mxu1 %v3385_v62 }
 0x6d0   : > { %6277 = vmatprep.subr.mxu1 %v6741_v2 }
 0x6d1   : > { %6278 = vmatpush3.msra.mxu1 %v3384_v0  ;;  %v5787_v0 = vld [vmem:[%s7700_s26] ss:$0 sm:$0xff] }
 0x6d2   : > { %6279 = vmatprep.subr.mxu1 %v6741_v2 }
 0x6d3   : > { %6280 = vmatpush3.msra.mxu1 %v3383_v3 }
 0x6d4   : > { %6281 = vmatprep.subr.mxu1 %v6741_v2 }
 0x6d5   : > { %6282 = vmatpush3.msra.mxu1 %v3382_v5 }
 0x6d6   : > { %6286 = vmatprep.subr.mxu1 %v6741_v2 }
 0x78e   : > { %v3258_v47 = vpop.f32.mrf.mxu1 }
 0x78f   : > { %v3259_v48 = vadd.f32 %v5781_v46, %v3258_v47  ;;  %v4042_v46 = vld [vmem:[%s7697_s9 + $0x48] sm:$0xff]  ;;  %v3721_v47 = vld [vmem:[%s7696_s1 + $0x60] sm:$0xff] }
 0x790   : > { %v6255_v49 = vpop.f32.mrf.mxu1 }
 0x791   : > { %v3262_v50 = vmax.f32 %v3259_v48, 0.0  ;;  %v4041_v48 = vld [vmem:[%s7697_s9 + $0x40] sm:$0xff]  ;;  %v4040_v49 = vld [vmem:[%s7697_s9 + $0x38] sm:$0xff] }
 0x793   : > { %6273 = vmatmul.mubr.msk.f32.vlgmr.msra.gmra.mxu0 %vm3278_vm14, %v3262_v50  ;;  %v4039_v50 = vld [vmem:[%s7697_s9 + $0x30] sm:$0xff] }
 0x794   : > { %6305 = vmatprep.mubr.msk.f32.mxu0 %vm6742_vm0, %v6741_v2  ;;  %6298 = vmatpush3.msra.mxu0 %v3393_v63 }
 0x795   : > { %6299 = vmatprep.subr.mxu0 %v6741_v2 }
 0x796   : > { %6300 = vmatpush3.msra.mxu0 %v3392_v1 }
 0x797   : > { %6301 = vmatprep.subr.mxu0 %v6741_v2 }
 0x798   : > { %6302 = vmatpush3.msra.mxu0 %v3391_v4 }
 0x799   : > { %6303 = vmatprep.subr.mxu0 %v6741_v2 }
 0x79a   : > { %6304 = vmatpush3.msra.mxu0 %v3390_v6  ;;  %v5797_v6 = vld [vmem:[%s7699_s18 + $0x2] ss:$0 sm:$0xff] }
 0x79b   : > { %6319 = vmatprep.subr.mxu0 %v6741_v2 }
 0x853   : > { %v3348_v52 = vpop.f32.mrf.mxu0 }
 0x854   : > { %v3349_v53 = vadd.f32 %v5783_v51, %v3348_v52  ;;  %v4038_v51 = vld [vmem:[%s7697_s9 + $0x28] sm:$0xff]  ;;  %v4037_v52 = vld [vmem:[%s7697_s9 + $0x20] sm:$0xff] }
 0x855   : > { %v6274_v54 = vpop.f32.mrf.mxu0 }
 0x856   : > { %v3352_v55 = vadd.f32 %v3349_v53, %v3177_v42  ;;  %v4044_v42 = vld [vmem:[%s7697_s9 + $0x58] sm:$0xff]  ;;  %v4047_v54 = vld [vmem:[%s7697_s9 + $0x70] sm:$0xff] }
 0x857   : > { %v4048_v53 = vld [vmem:[%s7697_s9 + $0x78] sm:$0xff] }
 0x858   : > { %v3355_v56 = vsel %vm1254_vm12, %v3352_v55, 0.0 }
 0x859   : > { %3356 = vadd.xlane.f32.xlu0 %v3355_v56  ;;  %v4045_v56 = vld [vmem:[%s7697_s9 + $0x60] sm:$0xff] }
 0x8e2   : > { %v3357_v57 = vpop.xlane.xlu0 %3356 }
 0x8e3   : > { %v3358_v58 = vmul.f32 0.03125, %v3357_v57 }
 0x8e5   : > { %v3359_v59 = vsub.f32 %v3352_v55, %v3358_v58  ;;  %v4046_v55 = vld [vmem:[%s7697_s9 + $0x68] sm:$0xff]  ;;  %s6643_s9 = sshll.u32 %s6743_s8, 4  ;;  %s6644_s9 = int_to_ptr.vmem [resolvable:$false] %s6643_s9 }
 0x8e6   : > { %s6645_s13 = scalar_lea.vmem %s6644_s9, 256 }
 0x8e7   : > { %v3360_v60 = vmul.f32 %v3359_v59, %v3359_v59 }
 0x8e9   : > { %v3361_v61 = vsel %vm1254_vm12, %v3360_v60, 0.0 }
 0x8ea   : > { %3362 = vadd.xlane.f32.xlu1 %v3361_v61  ;;  %v5795_v61 = vld [vmem:[%s7698_s0] ss:$0 sm:$0xff]  ;;  %s7705_s0 = sld [smem:[#allocation30_spill]] }
 0x8f0   : > { %s7706_s1 = smov %s7705_s0 }
 0x973   : > { %v3363_v7 = vpop.xlane.xlu1 %3362 }
 0x974   : > { %v3364_v8 = vmul.f32 0.03125, %v3363_v7 }
 0x976   : > { %v3365_v10 = vadd.f32 1e-05, %v3364_v8 }
 0x978   : > { %6605 = vrsqrt.f32 %v3365_v10  ;;  %v5789_v10 = vld [vmem:[%s7700_s26 + $0x2] ss:$0 sm:$0xff] }
 0x985   : > { %v6606_v11 = vpop.eup %6605 }
 0x986   : > { %v3367_v13 = vmul.f32 %v6606_v11, %v3359_v59 }
 0x988   : > { %v3374_v15 = vmul.f32 %v5785_v12, %v3367_v13 }
 0x98a   : > { %v7324_v16 = vadd.f32 %v5786_v14, %v3374_v15  ;;  %v5796_v15 = vld [vmem:[%s7699_s18 + $0x1] ss:$0 sm:$0xff] }
 0x98c   : > { %6284 = vmatmul.mubr.msk.f32.vlgmr.msra.gmra.mxu1 %vm1254_vm12, %v7324_v16  ;;  %6306 = vmatmul.mubr.msk.f32.vlgmr.msra.gmra.mxu0 %vm1254_vm12, %v7324_v16 }
 0x98d   : > { %6287 = vmatpush3.msra.mxu1 %v3389_v17  ;;  %6320 = vmatpush3.msra.mxu0 %v3712_v18  ;;  %v5788_v18 = vld [vmem:[%s7700_s26 + $0x1] ss:$0 sm:$0xff] }
 0x98e   : > { %6288 = vmatprep.subr.mxu1 %v6741_v2  ;;  %6321 = vmatprep.subr.mxu0 %v6741_v2 }
 0x98f   : > { %6289 = vmatpush3.msra.mxu1 %v3388_v19  ;;  %6322 = vmatpush3.msra.mxu0 %v3711_v20 }
 0x990   : > { %6290 = vmatprep.subr.mxu1 %v6741_v2  ;;  %6323 = vmatprep.subr.mxu0 %v6741_v2 }
 0x991   : > { %6291 = vmatpush3.msra.mxu1 %v3387_v21  ;;  %6324 = vmatpush3.msra.mxu0 %v3710_v22 }
 0x992   : > { %6292 = vmatprep.subr.mxu1 %v6741_v2  ;;  %6325 = vmatprep.subr.mxu0 %v6741_v2 }
 0x993   : > { %6293 = vmatpush3.msra.mxu1 %v3386_v23  ;;  %6294 = vmatprep.mubr.msk.f32.mxu1 %vm6742_vm0, %v6741_v2 }
 0x994   : > { %6326 = vmatpush3.msra.mxu0 %v3709_v24  ;;  %6327 = vmatprep.mubr.msk.f32.mxu0 %vm6742_vm0, %v6741_v2 }
 0x995   : > { %6295 = vmatmul.mubr.msk.f32.vlgmr.msra.gmra.mxu1 %vm1254_vm12, %v7324_v16  ;;  %6308 = vmatprep.subr.mxu1 %v6741_v2 }
 0x996   : > { %6328 = vmatmul.mubr.msk.f32.vlgmr.msra.gmra.mxu0 %vm1254_vm12, %v7324_v16  ;;  %6341 = vmatprep.subr.mxu0 %v6741_v2 }
 0x997   : > { %6309 = vmatpush3.msra.mxu1 %v3397_v25  ;;  %6342 = vmatpush3.msra.mxu0 %v3720_v26  ;;  %v5798_v25 = vld [vmem:[%s7699_s18 + $0x3] ss:$0 sm:$0xff] }
 0x998   : > { %6310 = vmatprep.subr.mxu1 %v6741_v2  ;;  %6343 = vmatprep.subr.mxu0 %v6741_v2 }
 0x999   : > { %6311 = vmatpush3.msra.mxu1 %v3396_v27  ;;  %6344 = vmatpush3.msra.mxu0 %v3719_v28  ;;  %v5790_v27 = vld [vmem:[%s7700_s26 + $0x3] ss:$0 sm:$0xff] }
 0x99a   : > { %6312 = vmatprep.subr.mxu1 %v6741_v2  ;;  %6345 = vmatprep.subr.mxu0 %v6741_v2 }
 0x99b   : > { %6313 = vmatpush3.msra.mxu1 %v3395_v29  ;;  %6346 = vmatpush3.msra.mxu0 %v3718_v30 }
 0x99c   : > { %6314 = vmatprep.subr.mxu1 %v6741_v2  ;;  %6347 = vmatprep.subr.mxu0 %v6741_v2 }
 0x99d   : > { %6315 = vmatpush3.msra.mxu1 %v3394_v31  ;;  %6316 = vmatprep.mubr.msk.f32.mxu1 %vm6742_vm0, %v6741_v2 }
 0x99e   : > { %6348 = vmatpush3.msra.mxu0 %v3717_v32  ;;  %6349 = vmatprep.mubr.msk.f32.mxu0 %vm6742_vm0, %v6741_v2 }
 0x99f   : > { %6317 = vmatmul.mubr.msk.f32.vlgmr.msra.gmra.mxu1 %vm1254_vm12, %v7324_v16  ;;  %6330 = vmatprep.subr.mxu1 %v6741_v2 }
 0x9a0   : > { %6350 = vmatmul.mubr.msk.f32.vlgmr.msra.gmra.mxu0 %vm1254_vm12, %v7324_v16  ;;  %6363 = vmatprep.subr.mxu0 %v6741_v2 }
 0x9a1   : > { %6331 = vmatpush3.msra.mxu1 %v3716_v33  ;;  %6364 = vmatpush3.msra.mxu0 %v4036_v34  ;;  %v5804_v33 = vld [vmem:[%s7701_s2 + $0x1] ss:$0 sm:$0xff] }
 0x9a2   : > { %6332 = vmatprep.subr.mxu1 %v6741_v2  ;;  %6365 = vmatprep.subr.mxu0 %v6741_v2 }
 0x9a3   : > { %6333 = vmatpush3.msra.mxu1 %v3715_v35  ;;  %6366 = vmatpush3.msra.mxu0 %v4035_v36 }
 0x9a4   : > { %6334 = vmatprep.subr.mxu1 %v6741_v2  ;;  %6367 = vmatprep.subr.mxu0 %v6741_v2 }
 0x9a5   : > { %6335 = vmatpush3.msra.mxu1 %v3714_v37  ;;  %6368 = vmatpush3.msra.mxu0 %v4034_v38 }
 0x9a6   : > { %6336 = vmatprep.subr.mxu1 %v6741_v2  ;;  %6369 = vmatprep.subr.mxu0 %v6741_v2 }
 0x9a7   : > { %6337 = vmatpush3.msra.mxu1 %v3713_v39  ;;  %6338 = vmatprep.mubr.msk.f32.mxu1 %vm6742_vm0, %v6741_v2 }
 0x9a8   : > { %6370 = vmatpush3.msra.mxu0 %v4033_v40  ;;  %6371 = vmatprep.mubr.msk.f32.mxu0 %vm6742_vm0, %v6741_v2 }
 0x9a9   : > { %6339 = vmatmul.mubr.msk.f32.vlgmr.msra.gmra.mxu1 %vm1254_vm12, %v7324_v16  ;;  %6352 = vmatprep.subr.mxu1 %v6741_v2 }
 0x9aa   : > { %6372 = vmatmul.mubr.msk.f32.vlgmr.msra.gmra.mxu0 %vm1254_vm12, %v7324_v16  ;;  %6385 = vmatprep.subr.mxu0 %v6741_v2 }
 0x9ab   : > { %6353 = vmatpush3.msra.mxu1 %v3724_v41  ;;  %6386 = vmatpush3.msra.mxu0 %v4044_v42 }
 0x9ac   : > { %6354 = vmatprep.subr.mxu1 %v6741_v2  ;;  %6387 = vmatprep.subr.mxu0 %v6741_v2 }
 0x9ad   : > { %6355 = vmatpush3.msra.mxu1 %v3723_v43  ;;  %6388 = vmatpush3.msra.mxu0 %v4043_v44 }
 0x9ae   : > { %6356 = vmatprep.subr.mxu1 %v6741_v2  ;;  %6389 = vmatprep.subr.mxu0 %v6741_v2 }
 0x9af   : > { %6357 = vmatpush3.msra.mxu1 %v3722_v45  ;;  %6390 = vmatpush3.msra.mxu0 %v4042_v46 }
 0x9b0   : > { %6358 = vmatprep.subr.mxu1 %v6741_v2  ;;  %6391 = vmatprep.subr.mxu0 %v6741_v2 }
 0x9b1   : > { %6359 = vmatpush3.msra.mxu1 %v3721_v47  ;;  %6360 = vmatprep.mubr.msk.f32.mxu1 %vm6742_vm0, %v6741_v2 }
 0x9b2   : > { %6392 = vmatpush3.msra.mxu0 %v4041_v48  ;;  %6393 = vmatprep.mubr.msk.f32.mxu0 %vm6742_vm0, %v6741_v2 }
 0x9b3   : > { %6361 = vmatmul.mubr.msk.f32.vlgmr.msra.gmra.mxu1 %vm1254_vm12, %v7324_v16  ;;  %6374 = vmatprep.subr.mxu1 %v6741_v2 }
 0x9b4   : > { %6394 = vmatmul.mubr.msk.f32.vlgmr.msra.gmra.mxu0 %vm1254_vm12, %v7324_v16  ;;  %6375 = vmatpush3.msra.mxu1 %v4040_v49 }
 0x9b5   : > { %6376 = vmatprep.subr.mxu1 %v6741_v2  ;;  %6382 = vmatprep.mubr.msk.f32.mxu1 %vm6742_vm0, %v6741_v2 }
 0x9b6   : > { %6377 = vmatpush3.msra.mxu1 %v4039_v50  ;;  %6407 = vmatprep.subr.mxu0 %v6741_v2 }
 0x9b7   : > { %6378 = vmatprep.subr.mxu1 %v6741_v2  ;;  %6409 = vmatprep.mubr.msk.f32.mxu0 %vm6742_vm0, %v6741_v2 }
 0x9b8   : > { %6379 = vmatpush3.msra.mxu1 %v4038_v51 }
 0x9b9   : > { %6380 = vmatprep.subr.mxu1 %v6741_v2 }
 0x9ba   : > { %6381 = vmatpush3.msra.mxu1 %v4037_v52 }
 0x9bb   : > { %6383 = vmatmul.mubr.msk.f32.vlgmr.msra.gmra.mxu1 %vm1254_vm12, %v7324_v16  ;;  %6396 = vmatprep.subr.mxu1 %v6741_v2 }
 0x9bc   : > { %6397 = vmatpush3.msra.mxu1 %v4048_v53  ;;  %6404 = vmatprep.mubr.msk.f32.mxu1 %vm6742_vm0, %v6741_v2 }
 0x9bd   : > { %6398 = vmatprep.subr.mxu1 %v6741_v2 }
 0x9be   : > { %6399 = vmatpush3.msra.mxu1 %v4047_v54 }
 0x9bf   : > { %6400 = vmatprep.subr.mxu1 %v6741_v2 }
 0x9c0   : > { %6401 = vmatpush3.msra.mxu1 %v4046_v55 }
 0x9c1   : > { %6402 = vmatprep.subr.mxu1 %v6741_v2 }
 0x9c2   : > { %6403 = vmatpush3.msra.mxu1 %v4045_v56 }
 0x9c3   : > { %6405 = vmatmul.mubr.msk.f32.vlgmr.msra.gmra.mxu1 %vm1254_vm12, %v7324_v16  ;;  %6417 = vmatprep.subr.mxu1 %v6741_v2  ;;  %v5803_v16 = vld [vmem:[%s7701_s2] ss:$0 sm:$0xff] }
 0x9c4   : > { %6419 = vmatprep.mubr.msk.f32.mxu1 %vm6742_vm0, %v6741_v2 }
 0xa4c   : > { %v3495_v57 = vpop.f32.mrf.mxu1  ;;  %v3635_v58 = vpop.f32.mrf.mxu0 }
 0xa4d   : > { %v3496_v5 = vadd.f32 %v5787_v0, %v3495_v57  ;;  %v3636_v14 = vadd.f32 %v5789_v10, %v3635_v58 }
 0xa4e   : > { %v6285_v59 = vpop.f32.mrf.mxu1  ;;  %v6307_v60 = vpop.f32.mrf.mxu0 }
 0xa55   : > { %v3565_v62 = vpop.f32.mrf.mxu1 }
 0xa56   : > { %v3819_v63 = vpop.f32.mrf.mxu0  ;;  %v3566_v24 = vadd.f32 %v5788_v18, %v3565_v62  ;;  %v5805_v18 = vld [vmem:[%s7701_s2 + $0x2] ss:$0 sm:$0xff] }
 0xa57   : > { %v3820_v1 = vadd.f32 %v5795_v61, %v3819_v63  ;;  %v6296_v3 = vpop.f32.mrf.mxu1 }
 0xa58   : > { %v6329_v4 = vpop.f32.mrf.mxu0 }
 0xa59   : > { %6408 = vmatpush3.xpose.msk.msra.mxu0 %vm2186_vm13, %v3820_v1 }
 0xa5a   : > { %6412 = vmatprep.subr.mxu0 %v6741_v2 }
 0xa5c   : > { %6410 = vmatmul.mubr.msk.f32.vlgmr.msra.gmra.mxu0 %vm2186_vm13, %v3496_v5 }
 0xa5d   : > { %6414 = vmatprep.mubr.msk.f32.mxu0 %vm6742_vm0, %v6741_v2 }
 0xa5f   : > { %v3705_v7 = vpop.f32.mrf.mxu1 }
 0xa60   : > { %v3959_v8 = vpop.f32.mrf.mxu0  ;;  %v3706_v32 = vadd.f32 %v5790_v27, %v3705_v7 }
 0xa61   : > { %v3960_v11 = vadd.f32 %v5797_v6, %v3959_v8  ;;  %v6318_v12 = vpop.f32.mrf.mxu1 }
 0xa62   : > { %v6351_v13 = vpop.f32.mrf.mxu0 }
 0xa63   : > { %6418 = vmatpush3.xpose.msk.msra.mxu1 %vm2186_vm13, %v3960_v11 }
 0xa64   : > { %6427 = vmatprep.subr.mxu1 %v6741_v2 }
 0xa66   : > { %6420 = vmatmul.mubr.msk.f32.vlgmr.msra.gmra.mxu1 %vm2186_vm13, %v3636_v14 }
 0xa67   : > { %6429 = vmatprep.mubr.msk.f32.mxu1 %vm6742_vm0, %v6741_v2 }
 0xa69   : > { %v3889_v17 = vpop.f32.mrf.mxu1 }
 0xa6a   : > { %v3890_v19 = vadd.f32 %v5796_v15, %v3889_v17  ;;  %v4143_v20 = vpop.f32.mrf.mxu0 }
 0xa6b   : > { %v4144_v21 = vadd.f32 %v5803_v16, %v4143_v20  ;;  %v6340_v22 = vpop.f32.mrf.mxu1 }
 0xa6c   : > { %v6373_v23 = vpop.f32.mrf.mxu0  ;;  %6413 = vmatpush3.xpose.msk.msra.mxu0 %vm2186_vm13, %v3890_v19 }
 0xa6d   : > { %6428 = vmatpush3.msra.mxu1 %v4144_v21  ;;  %6422 = vmatprep.subr.mxu0 %v6741_v2 }
 0xa6e   : > { %6437 = vmatprep.subr.mxu1 %v6741_v2 }
 0xa6f   : > { %6415 = vmatmul.mubr.msk.f32.vlgmr.msra.gmra.mxu0 %vm2186_vm13, %v3566_v24 }
 0xa70   : > { %6424 = vmatprep.mubr.msk.f32.mxu0 %vm6742_vm0, %v6741_v2 }
 0xa73   : > { %v4029_v26 = vpop.f32.mrf.mxu1 }
 0xa74   : > { %v4030_v28 = vadd.f32 %v5798_v25, %v4029_v26  ;;  %v7479_v29 = vpop.f32.mrf.mxu0  ;;  %v5806_v26 = vld [vmem:[%s7701_s2 + $0x3] ss:$0 sm:$0xff]  ;;  %s7708_s2 = sld [smem:[#allocation27_spill]] }
 0xa75   : > { %v6362_v30 = vpop.f32.mrf.mxu1  ;;  %v4284_v21 = vadd.f32 %v5805_v18, %v7479_v29 }
 0xa76   : > { %v6395_v31 = vpop.f32.mrf.mxu0  ;;  %6423 = vmatpush3.xpose.msk.msra.mxu0 %vm2186_vm13, %v4030_v28 }
 0xa77   : > { %6432 = vmatprep.subr.mxu0 %v6741_v2 }
 0xa79   : > { %6425 = vmatmul.mubr.msk.f32.vlgmr.msra.gmra.mxu0 %vm2186_vm13, %v3706_v32  ;;  %v5005_v32 = vld [vmem:[%s7702_s5] sm:$0xff] }
 0xa7a   : > { %6434 = vmatprep.mubr.msk.f32.mxu0 %vm6742_vm0, %v6741_v2 }
 0xa7b   : > { %v4213_v34 = vpop.f32.mrf.mxu1 }
 0xa7c   : > { %v4214_v35 = vadd.f32 %v5804_v33, %v4213_v34  ;;  %v5006_v33 = vld [vmem:[%s7702_s5 + $0x8] sm:$0xff]  ;;  %v5007_v34 = vld [vmem:[%s7702_s5 + $0x10] sm:$0xff] }
 0xa7d   : > { %v6384_v36 = vpop.f32.mrf.mxu1 }
 0xa7e   : > { %6433 = vmatpush3.msra.mxu0 %v4214_v35 }
 0xa7f   : > { %6442 = vmatprep.subr.mxu0 %v6741_v2 }
 0xa83   : > { %v7488_v37 = vpop.f32.mrf.mxu1 }
 0xa84   : > { %v4354_v29 = vadd.f32 %v5806_v26, %v7488_v37 }
 0xa85   : > { %v6406_v38 = vpop.f32.mrf.mxu1 }
 0xb1c   : > { %v4429_v39 = vpop.f32.mrf.mxu0 }
 0xb1d   : > { %v4661_v40 = vmul.f32 0.35355338, %v4429_v39  ;;  %v5008_v39 = vld [vmem:[%s7702_s5 + $0x18] sm:$0xff]  ;;  %s7598_s5 = scalar_lea.hbm %s6938_s12, %s6986_s7 }
 0xb1e   : > { %v6411_v41 = vpop.f32.mrf.mxu0 }
 0xb1f   : > { %v4665_v42 = vsel %vm7014_vm3, %v4661_v40, -1e+30 }
 0xb20   : > { %v4669_v43 = vsel %vm2186_vm13, %v4665_v42, -inf }
 0xb21   : > { %4670 = vmax.xlane.f32.xlu0 %v4669_v43 }
 0xb26   : > { %v4581_v44 = vpop.f32.mrf.mxu1 }
 0xb27   : > { %v4663_v45 = vmul.f32 0.35355338, %v4581_v44 }
 0xb28   : > { %v6421_v46 = vpop.f32.mrf.mxu1 }
 0xb29   : > { %v4667_v47 = vsel %vm7014_vm3, %v4663_v45, -1e+30 }
 0xb2a   : > { %v4675_v48 = vsel %vm2186_vm13, %v4667_v47, -inf }
 0xb2b   : > { %4676 = vmax.xlane.f32.xlu0 %v4675_v48 }
 0xb2f   : > { %v4505_v49 = vpop.f32.mrf.mxu0 }
 0xb30   : > { %v4662_v50 = vmul.f32 0.35355338, %v4505_v49 }
 0xb31   : > { %v6416_v51 = vpop.f32.mrf.mxu0 }
 0xb32   : > { %v4666_v52 = vsel %vm7014_vm3, %v4662_v50, -1e+30 }
 0xb33   : > { %v4672_v53 = vsel %vm2186_vm13, %v4666_v52, -inf }
 0xb34   : > { %4673 = vmax.xlane.f32.xlu1 %v4672_v53 }
 0xb39   : > { %v4657_v54 = vpop.f32.mrf.mxu0 }
 0xb3a   : > { %v4664_v55 = vmul.f32 0.35355338, %v4657_v54 }
 0xb3b   : > { %v6426_v56 = vpop.f32.mrf.mxu0 }
 0xb3c   : > { %v4668_v57 = vsel %vm7014_vm3, %v4664_v55, -1e+30 }
 0xb3d   : > { %v4678_v58 = vsel %vm2186_vm13, %v4668_v57, -inf }
 0xb3e   : > { %4679 = vmax.xlane.f32.xlu1 %v4678_v58 }
 0xbaa   : > { %v4671_v59 = vpop.xlane.xlu0 %4670 }
 0xbab   : > { %v4681_v60 = vsub.f32 %v4665_v42, %v4671_v59 }
 0xbad   : > { %v4685_v61 = vmul.f32 1.442695, %v4681_v60 }
 0xbaf   : > { %6607 = vpow2.f32 %v4685_v61 }
 0xbb4   : > { %v4677_v62 = vpop.xlane.xlu0 %4676 }
 0xbb5   : > { %v4683_v63 = vsub.f32 %v4667_v47, %v4677_v62 }
 0xbb7   : > { %v4689_v0 = vmul.f32 1.442695, %v4683_v63 }
 0xbb9   : > { %6609 = vpow2.f32 %v4689_v0 }
 0xbbc   : > { %v6608_v1 = vpop.eup %6607 }
 0xbbd   : > { %v4674_v3 = vpop.xlane.xlu1 %4673  ;;  %v4693_v4 = vsel %vm2186_vm13, %v6608_v1, 0.0 }
 0xbbe   : > { %v4682_v5 = vsub.f32 %v4666_v52, %v4674_v3  ;;  %4694 = vadd.xlane.f32.xlu0 %v4693_v4  ;;  %v5348_v4 = vld [vmem:[%s7704_s15 + $0x18] sm:$0xff] }
 0xbc0   : > { %v4687_v6 = vmul.f32 1.442695, %v4682_v5  ;;  %v5347_v5 = vld [vmem:[%s7704_s15 + $0x10] sm:$0xff] }
 0xbc2   : > { %6611 = vpow2.f32 %v4687_v6  ;;  %v5346_v6 = vld [vmem:[%s7704_s15 + $0x8] sm:$0xff] }
 0xbc6   : > { %v6610_v9 = vpop.eup %6609 }
 0xbc7   : > { %v4680_v7 = vpop.xlane.xlu1 %4679  ;;  %v4699_v8 = vsel %vm2186_vm13, %v6610_v9, 0.0 }
 0xbc8   : > { %v4684_v10 = vsub.f32 %v4668_v57, %v4680_v7  ;;  %4700 = vadd.xlane.f32.xlu0 %v4699_v8  ;;  %v5827_v57 = vld [vmem:[%s7703_s22] ss:$0 sm:$0xff]  ;;  %v5437_v7 = vld [vmem:[%s7705_s0 + $0x38] sm:$0xff]  ;;  %v5436_v8 = vld [vmem:[%s7706_s1 + $0x30] sm:$0xff]  ;;  %s7707_s22 = sld [smem:[#allocation26_spill]] }
 0xbc9   : > { %s7709_s0 = sld [smem:[#allocation29_spill]] }
 0xbca   : > { %v4691_v11 = vmul.f32 1.442695, %v4684_v10  ;;  %v5435_v10 = vld [vmem:[%s7706_s1 + $0x28] sm:$0xff] }
 0xbcc   : > { %6613 = vpow2.f32 %v4691_v11  ;;  %v5434_v11 = vld [vmem:[%s7706_s1 + $0x20] sm:$0xff] }
 0xbcf   : > { %v6612_v12 = vpop.eup %6611 }
 0xbd0   : > { %v4696_v13 = vsel %vm2186_vm13, %v6612_v12, 0.0 }
 0xbd1   : > { %4697 = vadd.xlane.f32.xlu1 %v4696_v13 }
 0xbd9   : > { %v6614_v14 = vpop.eup %6613 }
 0xbda   : > { %v4702_v15 = vsel %vm2186_vm13, %v6614_v14, 0.0 }
 0xbdb   : > { %4703 = vadd.xlane.f32.xlu1 %v4702_v15 }
 0xc47   : > { %v4695_v16 = vpop.xlane.xlu0 %4694 }
 0xc48   : > { %6615 = vrcp.f32 %v4695_v16 }
 0xc51   : > { %v4701_v17 = vpop.xlane.xlu0 %4700 }
 0xc52   : > { %6617 = vrcp.f32 %v4701_v17  ;;  %v5828_v17 = vld [vmem:[%s7707_s22] ss:$0 sm:$0xff] }
 0xc55   : > { %v6616_v19 = vpop.eup %6615 }
 0xc56   : > { %v4709_v20 = vmul.f32 %v6616_v19, %v6608_v1  ;;  %v5829_v19 = vld [vmem:[%s7708_s2] ss:$0 sm:$0xff]  ;;  %s7711_s2 = sld [smem:[#allocation32_spill]] }
 0xc58   : > { %6430 = vmatmul.mubr.msk.f32.vlgmr.msra.gmra.mxu1 %vm2186_vm13, %v4709_v20 }
 0xc59   : > { %6438 = vmatpush3.msra.mxu1 %v4284_v21  ;;  %6439 = vmatprep.mubr.msk.f32.mxu1 %vm6742_vm0, %v6741_v2 }
 0xc5a   : > { %v4698_v22 = vpop.xlane.xlu1 %4697  ;;  %6447 = vmatprep.subr.mxu1 %v6741_v2 }
 0xc5b   : > { %6619 = vrcp.f32 %v4698_v22  ;;  %v5432_v22 = vld [vmem:[%s7706_s1 + $0x10] sm:$0xff] }
 0xc5f   : > { %v6618_v23 = vpop.eup %6617 }
 0xc60   : > { %v4711_v24 = vmul.f32 %v6618_v23, %v6610_v9  ;;  %v5345_v9 = vld [vmem:[%s7704_s15] sm:$0xff]  ;;  %v5431_v23 = vld [vmem:[%s7706_s1 + $0x8] sm:$0xff] }
 0xc62   : > { %6440 = vmatmul.mubr.msk.f32.vlgmr.msra.gmra.mxu1 %vm2186_vm13, %v4711_v24  ;;  %v5430_v24 = vld [vmem:[%s7706_s1] sm:$0xff] }
 0xc63   : > { %6449 = vmatprep.mubr.msk.f32.mxu1 %vm6742_vm0, %v6741_v2  ;;  %6448 = vmatpush3.msra.mxu1 %v5005_v32 }
 0xc64   : > { %v4704_v25 = vpop.xlane.xlu1 %4703  ;;  %6457 = vmatprep.subr.mxu1 %v6741_v2 }
 0xc65   : > { %6621 = vrcp.f32 %v4704_v25  ;;  %v5830_v25 = vld [vmem:[%s7709_s0] ss:$0 sm:$0xff] }
 0xc68   : > { %v6620_v27 = vpop.eup %6619 }
 0xc69   : > { %v4710_v28 = vmul.f32 %v6620_v27, %v6612_v12  ;;  %v5433_v12 = vld [vmem:[%s7706_s1 + $0x18] sm:$0xff] }
 0xc6b   : > { %6435 = vmatmul.mubr.msk.f32.vlgmr.msra.gmra.mxu0 %vm2186_vm13, %v4710_v28 }
 0xc6c   : > { %6443 = vmatpush3.msra.mxu0 %v4354_v29  ;;  %6444 = vmatprep.mubr.msk.f32.mxu0 %vm6742_vm0, %v6741_v2 }
 0xc6d   : > { %6452 = vmatprep.subr.mxu0 %v6741_v2 }
 0xc72   : > { %v6622_v30 = vpop.eup %6621 }
 0xc73   : > { %v4712_v31 = vmul.f32 %v6622_v30, %v6614_v14  ;;  %v5832_v30 = vld [vmem:[%s7710_s3] ss:$0 sm:$0xff]  ;;  %s1082_s3 = sand.u32 1, %s6693_s11  }
 0xc74   : > { %s5734_s22 = sshll.u32 %s1082_s3, 3 }
 0xc75   : > { %6445 = vmatmul.mubr.msk.f32.vlgmr.msra.gmra.mxu0 %vm2186_vm13, %v4712_v31  ;;  %s1084_s0 = scalar_lea.vmem [#allocation4], %s5734_s22 }
 0xc76   : > { %6454 = vmatprep.mubr.msk.f32.mxu0 %vm6742_vm0, %v6741_v2  ;;  %6453 = vmatpush3.msra.mxu0 %v5006_v33  ;;  %s5647_s1 = sshll.u32 %s1084_s0, 4  ;;  %s5648_s1 = int_to_ptr.vmem [resolvable:$true] %s5647_s1 }
 0xc77   : > { %6462 = vmatprep.subr.mxu0 %v6741_v2  ;;  %s6639_s6 = scalar_lea.vmem %s5648_s1, 128  ;;  %p6646_p4 = scmp.lt.s32.totalorder %s5648_s1, %s6644_s9 }
 0xc78   : > { %p6640_p1 = scmp.ne.s32.totalorder %s5648_s1, %s6639_s6  ;;  %p6647_p5 = scmp.lt.s32.totalorder %s6645_s13, %s6639_s6 }
 0xc7a   : > { %p6641_p2 = pnand %p6640_p1, %p6975_p10  ;;  %p6648_p6 = por %p6647_p5, %p6646_p4 }
 0xc7c   : > { %p6642_p3 = pneg %p6641_p2 }
 0xc7e   : > { %p6649_p7 = pnand %p6648_p6, %p6642_p3 }
 0xd18   : > { %v4782_v35 = vpop.f32.mrf.mxu1 }
 0xd19   : > { %6450 = vmatmul.mubr.msk.f32.vlgmr.msra.gmra.mxu1 %vm2186_vm13, %v4782_v35 }
 0xd1a   : > { %v6431_v36 = vpop.f32.mrf.mxu1  ;;  %6458 = vmatpush3.msra.mxu1 %v5007_v34  ;;  %6459 = vmatprep.mubr.msk.f32.mxu1 %vm6742_vm0, %v6741_v2 }
 0xd1b   : > { %6467 = vmatprep.subr.mxu1 %v6741_v2 }
 0xd22   : > { %v4928_v37 = vpop.f32.mrf.mxu1 }
 0xd23   : > { %6460 = vmatmul.mubr.msk.f32.vlgmr.msra.gmra.mxu1 %vm2186_vm13, %v4928_v37 }
 0xd24   : > { %v6441_v38 = vpop.f32.mrf.mxu1  ;;  %6475 = vmatprep.mubr.msk.f32.mxu1 %vm6742_vm0, %v6741_v2  ;;  %6468 = vmatpush3.msra.mxu1 %v5348_v4 }
 0xd25   : > { %6469 = vmatprep.subr.mxu1 %v6741_v2 }
 0xd26   : > { %6470 = vmatpush3.msra.mxu1 %v5347_v5 }
 0xd27   : > { %6471 = vmatprep.subr.mxu1 %v6741_v2 }
 0xd28   : > { %6472 = vmatpush3.msra.mxu1 %v5346_v6 }
 0xd29   : > { %6473 = vmatprep.subr.mxu1 %v6741_v2 }
 0xd2a   : > { %6474 = vmatpush3.msra.mxu1 %v5345_v9 }
 0xd2b   : > { %v4855_v40 = vpop.f32.mrf.mxu0  ;;  %6497 = vmatprep.subr.mxu1 %v6741_v2 }
 0xd2c   : > { %6455 = vmatmul.mubr.msk.f32.vlgmr.msra.gmra.mxu0 %vm2186_vm13, %v4855_v40 }
 0xd2d   : > { %v6436_v41 = vpop.f32.mrf.mxu0  ;;  %6463 = vmatpush3.msra.mxu0 %v5008_v39  ;;  %6464 = vmatprep.mubr.msk.f32.mxu0 %vm6742_vm0, %v6741_v2 }
 0xd2e   : > { %6478 = vmatprep.subr.mxu0 %v6741_v2  ;;  %v5551_v41 = vld [vmem:[%s6927_s23 + $0x18] sm:$0xff] }
 0xd35   : > { %v5001_v42 = vpop.f32.mrf.mxu0 }
 0xd36   : > { %6465 = vmatmul.mubr.msk.f32.vlgmr.msra.gmra.mxu0 %vm2186_vm13, %v5001_v42  ;;  %v5550_v42 = vld [vmem:[%s6927_s23 + $0x10] sm:$0xff] }
 0xd37   : > { %v6446_v43 = vpop.f32.mrf.mxu0  ;;  %6494 = vmatprep.mubr.msk.f32.mxu0 %vm6742_vm0, %v6741_v2  ;;  %6479 = vmatpush3.msra.mxu0 %v5437_v7 }
 0xd38   : > { %6480 = vmatprep.subr.mxu0 %v6741_v2  ;;  %v5549_v43 = vld [vmem:[%s6927_s23 + $0x8] sm:$0xff] }
 0xd39   : > { %6481 = vmatpush3.msra.mxu0 %v5436_v8 }
 0xd3a   : > { %6482 = vmatprep.subr.mxu0 %v6741_v2 }
 0xd3b   : > { %6483 = vmatpush3.msra.mxu0 %v5435_v10 }
 0xd3c   : > { %6484 = vmatprep.subr.mxu0 %v6741_v2 }
 0xd3d   : > { %6485 = vmatpush3.msra.mxu0 %v5434_v11 }
 0xd3e   : > { %6486 = vmatprep.subr.mxu0 %v6741_v2 }
 0xd3f   : > { %6487 = vmatpush3.msra.mxu0 %v5433_v12 }
 0xd40   : > { %6488 = vmatprep.subr.mxu0 %v6741_v2 }
 0xd41   : > { %6489 = vmatpush3.msra.mxu0 %v5432_v22 }
 0xd42   : > { %6490 = vmatprep.subr.mxu0 %v6741_v2 }
 0xd43   : > { %6491 = vmatpush3.msra.mxu0 %v5431_v23 }
 0xd44   : > { %6492 = vmatprep.subr.mxu0 %v6741_v2 }
 0xd45   : > { %6493 = vmatpush3.msra.mxu0 %v5430_v24 }
 0xdd9   : > { %v5078_v44 = vpop.f32.mrf.mxu1 }
 0xdda   : > { %v5301_v51 = vsel %vm1254_vm12, %v5078_v44, 0.0  ;;  %v5548_v44 = vld [vmem:[%s6927_s23] sm:$0xff] }
 0xddb   : > { %v6451_v45 = vpop.f32.mrf.mxu1 }
 0xde3   : > { %v5224_v46 = vpop.f32.mrf.mxu1 }
 0xde4   : > { %v5304_v53 = vsel %vm1254_vm12, %v5224_v46, 0.0 }
 0xde5   : > { %v6461_v47 = vpop.f32.mrf.mxu1 }
 0xdec   : > { %v5151_v48 = vpop.f32.mrf.mxu0 }
 0xded   : > { %v5302_v50 = vsel %vm1254_vm12, %v5151_v48, 0.0 }
 0xdee   : > { %v6456_v49 = vpop.f32.mrf.mxu0  ;;  %v5303_v52 = vadd.f32 %v5302_v50, %v5301_v51  ;;  %v5835_v51 = vld [vmem:[%s6922_s16] ss:$0 sm:$0xff] }
 0xdef   : > { %v5834_v49 = vld [vmem:[%s7711_s2] ss:$0 sm:$0xff]  ;;  %s5634_s2 = scalar_lea.sflag [#allocation5], %s1082_s3 }
 0xdf0   : > { %v5305_v55 = vadd.f32 %v5304_v53, %v5303_v52 }
 0xdf6   : > { %v5297_v54 = vpop.f32.mrf.mxu0 }
 0xdf7   : > { %v5306_v56 = vsel %vm1254_vm12, %v5297_v54, 0.0  ;;  %v5836_v54 = vld [vmem:[%s6933_s28] ss:$0 sm:$0xff] }
 0xdf8   : > { %v5307_v58 = vadd.f32 %v5306_v56, %v5305_v55  ;;  %v6466_v59 = vpop.f32.mrf.mxu0 }
 0xdfa   : > { %v5315_v60 = vadd.f32 %v5827_v57, %v5307_v58 }
 0xdfc   : > { %v5318_v61 = vsel %vm1254_vm12, %v5315_v60, 0.0 }
 0xdfd   : > { %5319 = vadd.xlane.f32.xlu0 %v5318_v61 }
 0xe86   : > { %v5320_v62 = vpop.xlane.xlu0 %5319 }
 0xe87   : > { %v5321_v63 = vmul.f32 0.03125, %v5320_v62 }
 0xe89   : > { %v5322_v0 = vsub.f32 %v5315_v60, %v5321_v63 }
 0xe8b   : > { %v5323_v1 = vmul.f32 %v5322_v0, %v5322_v0 }
 0xe8d   : > { %v5324_v3 = vsel %vm1254_vm12, %v5323_v1, 0.0 }
 0xe8e   : > { %5325 = vadd.xlane.f32.xlu1 %v5324_v3 }
 0xf17   : > { %v5326_v13 = vpop.xlane.xlu1 %5325 }
 0xf18   : > { %v5327_v14 = vmul.f32 0.03125, %v5326_v13 }
 0xf1a   : > { %v5328_v15 = vadd.f32 1e-05, %v5327_v14 }
 0xf1c   : > { %6623 = vrsqrt.f32 %v5328_v15 }
 0xf29   : > { %v6624_v16 = vpop.eup %6623 }
 0xf2a   : > { %v5330_v18 = vmul.f32 %v6624_v16, %v5322_v0 }
 0xf2c   : > { %v5337_v20 = vmul.f32 %v5828_v17, %v5330_v18 }
 0xf2e   : > { %v5344_v21 = vadd.f32 %v5829_v19, %v5337_v20 }
 0xf30   : > { %6476 = vmatmul.mubr.msk.f32.vlgmr.msra.gmra.mxu1 %vm1254_vm12, %v5344_v21 }
 0xf31   : > { %6505 = vmatprep.mubr.msk.f32.mxu1 %vm6742_vm0, %v6741_v2  ;;  %6498 = vmatpush3.msra.mxu1 %v5551_v41 }
 0xf32   : > { %6499 = vmatprep.subr.mxu1 %v6741_v2 }
 0xf33   : > { %6500 = vmatpush3.msra.mxu1 %v5550_v42 }
 0xf34   : > { %6501 = vmatprep.subr.mxu1 %v6741_v2 }
 0xf35   : > { %6502 = vmatpush3.msra.mxu1 %v5549_v43 }
 0xf36   : > { %6503 = vmatprep.subr.mxu1 %v6741_v2 }
 0xf37   : > { %6504 = vmatpush3.msra.mxu1 %v5548_v44 }
 0xff0   : > { %v5425_v26 = vpop.f32.mrf.mxu1 }
 0xff1   : > { %v5426_v27 = vadd.f32 %v5830_v25, %v5425_v26 }
 0xff2   : > { %v6477_v28 = vpop.f32.mrf.mxu1 }
 0xff3   : > { %v5429_v29 = vmax.f32 %v5426_v27, 0.0 }
 0xff5   : > { %6495 = vmatmul.mubr.msk.f32.vlgmr.msra.gmra.mxu0 %vm3278_vm14, %v5429_v29 }
0x10b5   : > { %v5514_v31 = vpop.f32.mrf.mxu0 }
0x10b6   : > { %v5515_v32 = vadd.f32 %v5832_v30, %v5514_v31 }
0x10b7   : > { %v6496_v33 = vpop.f32.mrf.mxu0 }
0x10b8   : > { %v5518_v34 = vadd.f32 %v5515_v32, %v5344_v21 }
0x10ba   : > { %v5521_v35 = vsel %vm1254_vm12, %v5518_v34, 0.0 }
0x10bb   : > { %5522 = vadd.xlane.f32.xlu0 %v5521_v35 }
0x1144   : > { %v5523_v36 = vpop.xlane.xlu0 %5522 }
0x1145   : > { %v5524_v37 = vmul.f32 0.03125, %v5523_v36 }
0x1147   : > { %v5525_v38 = vsub.f32 %v5518_v34, %v5524_v37 }
0x1149   : > { %v5526_v39 = vmul.f32 %v5525_v38, %v5525_v38 }
0x114b   : > { %v5527_v40 = vsel %vm1254_vm12, %v5526_v39, 0.0 }
0x114c   : > { %5528 = vadd.xlane.f32.xlu1 %v5527_v40 }
0x11d5   : > { %v5529_v45 = vpop.xlane.xlu1 %5528 }
0x11d6   : > { %v5530_v46 = vmul.f32 0.03125, %v5529_v45 }
0x11d8   : > { %v5531_v47 = vadd.f32 1e-05, %v5530_v46 }
0x11da   : > { %6625 = vrsqrt.f32 %v5531_v47 }
0x11e7   : > { %v6626_v48 = vpop.eup %6625 }
0x11e8   : > { %v5533_v50 = vmul.f32 %v6626_v48, %v5525_v38 }
0x11ea   : > { %v5540_v52 = vmul.f32 %v5834_v49, %v5533_v50 }
0x11ec   : > { %v5547_v53 = vadd.f32 %v5835_v51, %v5540_v52 }
0x11ee   : > { %6506 = vmatmul.mubr.msk.f32.vlgmr.msra.gmra.mxu1 %vm1254_vm12, %v5547_v53 }
0x12ae   : > { %v5628_v2 = vpop.f32.mrf.mxu1 }
0x12af   : > { %v5629_v55 = vadd.f32 %v5836_v54, %v5628_v2 }
0x12b0   : > { %v6507_v56 = vpop.f32.mrf.mxu1 }
0x12b1   : > { %5632 = vst [vmem:[%s1084_s0] sm:$0xff] %v5629_v55 }
0x12b2   : > { %6652 = shalt.err (!%p6649_p7)
}
0x12b3   : > { %s6653_s7 = scalar_lea.hbm %s7598_s5, 128  ;;  %s6657_s3 = scalar_lea.hbm %s6938_s12, 256 }
0x12b4   : > { %p6654_p8 = scmp.ne.s32.totalorder %s7598_s5, %s6653_s7  ;;  %p6658_p13 = scmp.lt.s32.totalorder %s7598_s5, %s6938_s12 }
0x12b5   : > { %p6659_p0 = scmp.lt.s32.totalorder %s6657_s3, %s6653_s7 }
0x12b6   : > { %p6655_p9 = pnand %p6654_p8, %p6975_p10 }
0x12b7   : > { %p6660_p1 = por %p6659_p0, %p6658_p13 }
0x12b8   : > { %p6656_p12 = pneg %p6655_p9 }
0x12ba   : > { %p6661_p2 = pnand %p6660_p1, %p6656_p12 }
0x12bc   : > { %6664 = shalt.err (!%p6661_p2)
}
0x12bd   : > { %6508 = dma.vmem_to_hbm [thread:$0]  (%p6975_p10), %s5648_s1, 128, %s7598_s5, %s5634_s2  }
0x12be PF: > { %p6514_p3 = scmp.ge.s32.totalorder %s6701_s10, 2  ;;  %s5659_s8 = sand.u32 1, %s6689_s27  }
0x12bf   : > { %s5660_s6 = scalar_lea.sflag [#allocation5], %s5659_s8 }
0x12c0   : > { %p6511_p4 = pnand %p6514_p3, %p6979_p11 }
0x12c2   : > { %p6512_p5 = pneg %p6511_p4 }
0x12c4   : > { %6684 = dma.done.wait (%p6512_p5), %s5660_s6, 128  }
0x12c5   : > { %6686 = vsyncadd (%p6512_p5), %s5660_s6, 4294967168  ;;  %s7713_s10 = sld [smem:[#allocation34_spill]]  ;;  %s7716_s27 = smov %s6693_s11 }
0x12c6   : > { %s7714_s9 = sld [smem:[#allocation33_spill]] }
0x12c7   : > { %s7715_s0 = sld [smem:[#allocation35_spill]] }
0x12cb   : > { %p91_p6 = scmp.ge.s32.totalorder %s7713_s10, 4  }
0x12cc   : > { %s7717_s11 = smov %s7714_s9 }
0x12cd   :  { %93 = sbr.rel (!%p91_p6) target bundleno = 73 (0x49), region = 233 }
0x12d2   :  { %5665 = vsyncpa [#allocation5], 1 }
0x12d3   :  { %5667 = vsyncpa [#allocation5 + $0x1], 1 }

</bundles_post_ra>
